<compile_context>
chip_gen: v7x
topology: tpu7x:2x2x1
jax: 0.10.0
libtpu: 0.0.40
codegen_flags: <defaults>
</compile_context>

<pallas_src>
import functools

import numpy as np
import jax
import jax.numpy as jnp
from jax.experimental import pallas as pl
from jax.experimental.pallas import tpu as pltpu


def _round_up(x, m):
    return ((x + m - 1) // m) * m


def _cdiv(a, b):
    return -(-a // b)


def _mpir2c_kernel(h_ref, wc_ref, ws_ref, wi_ref, bias_ref, c_ref, *,
                   forward_on_vpu):
    # h_ref   : (bb, N)    impulse-response tile
    # wc_ref  : (N, Kp)    cos forward half-DFT matrix (padded bins are 0)
    # ws_ref  : (N, Kp)    -sin forward half-DFT matrix (padded bins are 0)
    # wi_ref  : (Kp, M+1)  inverse-DFT matrix (symmetry, 1/n_fft, x2 for m>=1
    #                      and the 0.5 of log|H| all folded in; padded rows 0)
    # bias_ref: (1, Kp)    exactly 1.0 on padded bins, 0.0 on valid bins
    # c_ref   : (bb, M+1)  output tile
    h = h_ref[...].astype(jnp.float32)
    n_taps = h_ref.shape[-1]

    if forward_on_vpu:
        # Rank-1 broadcast MACs on the VPU: avoids feeding a K=n_taps (<=32)
        # contraction through full MXU passes (reviewer's main compute lever
        # for short impulse responses).
        h0 = h[:, 0:1]
        hr = h0 * wc_ref[0:1, :]
        hi = h0 * ws_ref[0:1, :]
        for n in range(1, n_taps):
            hn = h[:, n:n + 1]
            hr = hr + hn * wc_ref[n:n + 1, :]
            hi = hi + hn * ws_ref[n:n + 1, :]
    else:
        hr = jnp.dot(h, wc_ref[...], preferred_element_type=jnp.float32)
        hi = jnp.dot(h, ws_ref[...], preferred_element_type=jnp.float32)

    # |H|^2; padded bins get +1.0 (their wi rows are zero) so they never
    # produce -inf/NaN.  Valid bins keep exact reference semantics.
    sq = hr * hr + hi * hi + bias_ref[...]
    logmag = jnp.log(sq)                     # 0.5 factor folded into wi

    # Inverse half-DFT restricted to the first M+1 quefrencies (MXU).
    c = jnp.dot(logmag, wi_ref[...], preferred_element_type=jnp.float32)
    c_ref[...] = c.astype(c_ref.dtype)


def mpir2c(h, cep_order, ir_length, n_fft=512, block_b=1024,
           forward_on_vpu=None):
    """Minimum-phase impulse response -> cepstrum.  h: (..., ir_length)."""
    assert 0 <= cep_order
    assert 1 <= ir_length
    assert max(cep_order + 1, ir_length) < n_fft
    assert h.shape[-1] == ir_length, "impulse response length mismatch"

    orig_lead = h.shape[:-1]
    B = int(np.prod(orig_lead)) if orig_lead else 1
    hb = h.reshape(B, ir_length)             # metadata-only for contiguous h

    M1 = cep_order + 1
    K_half = n_fft // 2 + 1                  # unique real-FFT bins
    Kp = _round_up(K_half, 128)              # lane-padded bin axis

    # ---- host-side deterministic weights (float64 -> float32) -------------
    nn = np.arange(ir_length, dtype=np.float64)[:, None]
    kk = np.arange(K_half, dtype=np.float64)[None, :]
    ang = 2.0 * np.pi * nn * kk / n_fft
    wc = np.zeros((ir_length, Kp), dtype=np.float64)
    ws = np.zeros((ir_length, Kp), dtype=np.float64)
    wc[:, :K_half] = np.cos(ang)
    ws[:, :K_half] = -np.sin(ang)

    sym = np.full((K_half,), 2.0, dtype=np.float64)   # conjugate symmetry
    sym[0] = 1.0
    if n_fft % 2 == 0:
        sym[K_half - 1] = 1.0                          # Nyquist bin
    kcol = np.arange(K_half, dtype=np.float64)[:, None]
    mrow = np.arange(M1, dtype=np.float64)[None, :]
    wi_core = sym[:, None] * np.cos(2.0 * np.pi * kcol * mrow / n_fft) / n_fft
    wi_core[:, 1:] *= 2.0                              # minimum-phase doubling
    wi_core *= 0.5                                     # 0.5 of log|H|^2 (exact)
    wi = np.zeros((Kp, M1), dtype=np.float64)
    wi[:K_half, :] = wi_core

    bias = np.zeros((1, Kp), dtype=np.float64)
    bias[0, K_half:] = 1.0                             # padded bins -> log(1)=0

    wc = jnp.asarray(wc, jnp.float32)
    ws = jnp.asarray(ws, jnp.float32)
    wi = jnp.asarray(wi, jnp.float32)
    bias = jnp.asarray(bias, jnp.float32)

    if forward_on_vpu is None:
        forward_on_vpu = ir_length <= 32               # reviewer's threshold

    # ---- batch tiling ------------------------------------------------------
    # >=4 grid steps (when B allows) keeps ragged-tail waste small and gives a
    # v7x megacore something to shard; cap the tile by block_b and VMEM budget.
    per_row_bytes = 4 * (2 * ir_length + 2 * M1 + 4 * Kp)
    if B <= 8:
        bb = B                                         # single (full-dim) tile
    else:
        bb = min(_round_up(block_b, 8),
                 max(8, _round_up(_cdiv(B, 4), 8)))
        tile_budget = 32 << 20
        bb = min(bb, max(8, (tile_budget // per_row_bytes) // 8 * 8))
    num_steps = _cdiv(B, bb)                           # ragged tail handled by
                                                       # Pallas partial blocks

    w_bytes = 4 * (2 * ir_length * Kp + Kp * M1 + Kp)
    footprint = 2 * w_bytes + per_row_bytes * bb
    vmem_limit = int(min(max(2 * footprint + (8 << 20), 32 << 20), 56 << 20))

    kernel = functools.partial(_mpir2c_kernel, forward_on_vpu=forward_on_vpu)

    def _run(single_buffer_weights):
        def const_spec(shape):
            # Constant index_map -> no prefetch overlap needed; single-buffer
            # to halve the VMEM spent on weights.
            if single_buffer_weights:
                return pl.BlockSpec(shape, lambda i: (0, 0),
                                    pipeline_mode=pl.Buffered(1))
            return pl.BlockSpec(shape, lambda i: (0, 0))

        grid_spec = pltpu.PrefetchScalarGridSpec(
            num_scalar_prefetch=0,
            grid=(num_steps,),
            in_specs=[
                pl.BlockSpec((bb, ir_length), lambda i: (i, 0)),
                const_spec((ir_length, Kp)),
                const_spec((ir_length, Kp)),
                const_spec((Kp, M1)),
                const_spec((1, Kp)),
            ],
            out_specs=pl.BlockSpec((bb, M1), lambda i: (i, 0)),
        )
        return pl.pallas_call(
            kernel,
            out_shape=jax.ShapeDtypeStruct((B, M1), h.dtype),
            grid_spec=grid_spec,
            compiler_params=pltpu.CompilerParams(
                dimension_semantics=("parallel",),
                vmem_limit_bytes=vmem_limit),
        )(hb, wc, ws, wi, bias)

    try:
        out = _run(True)
    except Exception:
        # Fallback for JAX builds that reject pipeline_mode=pl.Buffered(1);
        # identical kernel, default double-buffered weights.
        out = _run(False)

    return out.reshape(orig_lead + (M1,))


def _reference(h, cep_order, n_fft):
    H = jnp.fft.fft(h.astype(jnp.float32), n=n_fft)
    c = jnp.fft.ifft(jnp.log(jnp.abs(H)))[..., : cep_order + 1].real
    c = c.at[..., 1:].multiply(2.0)
    return c.astype(h.dtype)


if __name__ == "__main__":
    key = jax.random.PRNGKey(0)
    k1, k2 = jax.random.split(key)

    # --- Test 1: small multi-dim batch, VPU forward path (ir_length <= 32) --
    cep_order, ir_length, n_fft = 7, 16, 128
    h = 0.05 * jax.random.normal(k1, (2, 4, ir_length), dtype=jnp.float32)
    h = h.at[..., 0].add(1.0)        # dominant first tap keeps |H| well-behaved
    c = jax.block_until_ready(mpir2c(h, cep_order, ir_length, n_fft=n_fft))
    c_ref = jax.block_until_ready(_reference(h, cep_order, n_fft))
    assert c.shape == (2, 4, cep_order + 1)
    np.testing.assert_allclose(np.asarray(c), np.asarray(c_ref),
                               rtol=2e-3, atol=2e-3)

    # --- Test 2: ragged batch (B=20 -> grid of 3 with masked tail), MXU path -
    cep_order2, ir_length2, n_fft2 = 4, 40, 128
    h2 = 0.02 * jax.random.normal(k2, (20, ir_length2), dtype=jnp.float32)
    h2 = h2.at[..., 0].add(1.0)
    c2 = jax.block_until_ready(mpir2c(h2, cep_order2, ir_length2, n_fft=n_fft2))
    c2_ref = jax.block_until_ready(_reference(h2, cep_order2, n_fft2))
    assert c2.shape == (20, cep_order2 + 1)
    np.testing.assert_allclose(np.asarray(c2), np.asarray(c2_ref),
                               rtol=2e-3, atol=2e-3)

    print("KERNEL_OK")
</pallas_src>

<mosaic_0001>
module attributes {stable_mosaic.version = 11 : i64} {
  func.func @_mpir2c_kernel(%arg0: i32, %arg1: memref<8x16xf32, #tpu.memory_space<vmem>>, %arg2: memref<16x128xf32, #tpu.memory_space<vmem>>, %arg3: memref<16x128xf32, #tpu.memory_space<vmem>>, %arg4: memref<128x8xf32, #tpu.memory_space<vmem>>, %arg5: memref<1x128xf32, #tpu.memory_space<vmem>>, %arg6: memref<8x8xf32, #tpu.memory_space<vmem>>) attributes {dimension_semantics = [#tpu.dimension_semantics<parallel>], iteration_bounds = array<i64: 1>, scalar_prefetch = 0 : i64, scratch_operands = 0 : i64, tpu.core_type = #tpu.core_type<tc>, window_params = [{transform_indices = @transform_0, window_bounds = array<i64: 8, 16>}, {pipeline_mode = #tpu.pipeline_mode<synchronous>, transform_indices = @transform_1, window_bounds = array<i64: 16, 128>}, {pipeline_mode = #tpu.pipeline_mode<synchronous>, transform_indices = @transform_2, window_bounds = array<i64: 16, 128>}, {pipeline_mode = #tpu.pipeline_mode<synchronous>, transform_indices = @transform_3, window_bounds = array<i64: 128, 8>}, {pipeline_mode = #tpu.pipeline_mode<synchronous>, transform_indices = @transform_4, window_bounds = array<i64: 1, 128>}, {transform_indices = @transform_5, window_bounds = array<i64: 8, 8>}]} {
    %c0 = arith.constant 0 : index
    %c0_0 = arith.constant 0 : index
    %0 = vector.load %arg1[%c0, %c0_0] : memref<8x16xf32, #tpu.memory_space<vmem>>, vector<8x16xf32>
    %1 = vector.extract_strided_slice %0 {offsets = [0, 0], sizes = [8, 1], strides = [1, 1]} : vector<8x16xf32> to vector<8x1xf32>
    %c0_1 = arith.constant 0 : index
    %c0_2 = arith.constant 0 : index
    %2 = vector.load %arg2[%c0_1, %c0_2] : memref<16x128xf32, #tpu.memory_space<vmem>>, vector<1x128xf32>
    %3 = vector.broadcast %1 : vector<8x1xf32> to vector<8x128xf32>
    %4 = vector.broadcast %2 : vector<1x128xf32> to vector<8x128xf32>
    %5 = arith.mulf %3, %4 : vector<8x128xf32>
    %c0_3 = arith.constant 0 : index
    %c0_4 = arith.constant 0 : index
    %6 = vector.load %arg3[%c0_3, %c0_4] : memref<16x128xf32, #tpu.memory_space<vmem>>, vector<1x128xf32>
    %7 = vector.broadcast %1 : vector<8x1xf32> to vector<8x128xf32>
    %8 = vector.broadcast %6 : vector<1x128xf32> to vector<8x128xf32>
    %9 = arith.mulf %7, %8 : vector<8x128xf32>
    %10 = vector.extract_strided_slice %0 {offsets = [0, 1], sizes = [8, 1], strides = [1, 1]} : vector<8x16xf32> to vector<8x1xf32>
    %c1 = arith.constant 1 : index
    %c0_5 = arith.constant 0 : index
    %11 = vector.load %arg2[%c1, %c0_5] : memref<16x128xf32, #tpu.memory_space<vmem>>, vector<1x128xf32>
    %12 = vector.broadcast %10 : vector<8x1xf32> to vector<8x128xf32>
    %13 = vector.broadcast %11 : vector<1x128xf32> to vector<8x128xf32>
    %14 = arith.mulf %12, %13 : vector<8x128xf32>
    %15 = arith.addf %5, %14 : vector<8x128xf32>
    %c1_6 = arith.constant 1 : index
    %c0_7 = arith.constant 0 : index
    %16 = vector.load %arg3[%c1_6, %c0_7] : memref<16x128xf32, #tpu.memory_space<vmem>>, vector<1x128xf32>
    %17 = vector.broadcast %10 : vector<8x1xf32> to vector<8x128xf32>
    %18 = vector.broadcast %16 : vector<1x128xf32> to vector<8x128xf32>
    %19 = arith.mulf %17, %18 : vector<8x128xf32>
    %20 = arith.addf %9, %19 : vector<8x128xf32>
    %21 = vector.extract_strided_slice %0 {offsets = [0, 2], sizes = [8, 1], strides = [1, 1]} : vector<8x16xf32> to vector<8x1xf32>
    %c2 = arith.constant 2 : index
    %c0_8 = arith.constant 0 : index
    %22 = vector.load %arg2[%c2, %c0_8] : memref<16x128xf32, #tpu.memory_space<vmem>>, vector<1x128xf32>
    %23 = vector.broadcast %21 : vector<8x1xf32> to vector<8x128xf32>
    %24 = vector.broadcast %22 : vector<1x128xf32> to vector<8x128xf32>
    %25 = arith.mulf %23, %24 : vector<8x128xf32>
    %26 = arith.addf %15, %25 : vector<8x128xf32>
    %c2_9 = arith.constant 2 : index
    %c0_10 = arith.constant 0 : index
    %27 = vector.load %arg3[%c2_9, %c0_10] : memref<16x128xf32, #tpu.memory_space<vmem>>, vector<1x128xf32>
    %28 = vector.broadcast %21 : vector<8x1xf32> to vector<8x128xf32>
    %29 = vector.broadcast %27 : vector<1x128xf32> to vector<8x128xf32>
    %30 = arith.mulf %28, %29 : vector<8x128xf32>
    %31 = arith.addf %20, %30 : vector<8x128xf32>
    %32 = vector.extract_strided_slice %0 {offsets = [0, 3], sizes = [8, 1], strides = [1, 1]} : vector<8x16xf32> to vector<8x1xf32>
    %c3 = arith.constant 3 : index
    %c0_11 = arith.constant 0 : index
    %33 = vector.load %arg2[%c3, %c0_11] : memref<16x128xf32, #tpu.memory_space<vmem>>, vector<1x128xf32>
    %34 = vector.broadcast %32 : vector<8x1xf32> to vector<8x128xf32>
    %35 = vector.broadcast %33 : vector<1x128xf32> to vector<8x128xf32>
    %36 = arith.mulf %34, %35 : vector<8x128xf32>
    %37 = arith.addf %26, %36 : vector<8x128xf32>
    %c3_12 = arith.constant 3 : index
    %c0_13 = arith.constant 0 : index
    %38 = vector.load %arg3[%c3_12, %c0_13] : memref<16x128xf32, #tpu.memory_space<vmem>>, vector<1x128xf32>
    %39 = vector.broadcast %32 : vector<8x1xf32> to vector<8x128xf32>
    %40 = vector.broadcast %38 : vector<1x128xf32> to vector<8x128xf32>
    %41 = arith.mulf %39, %40 : vector<8x128xf32>
    %42 = arith.addf %31, %41 : vector<8x128xf32>
    %43 = vector.extract_strided_slice %0 {offsets = [0, 4], sizes = [8, 1], strides = [1, 1]} : vector<8x16xf32> to vector<8x1xf32>
    %c4 = arith.constant 4 : index
    %c0_14 = arith.constant 0 : index
    %44 = vector.load %arg2[%c4, %c0_14] : memref<16x128xf32, #tpu.memory_space<vmem>>, vector<1x128xf32>
    %45 = vector.broadcast %43 : vector<8x1xf32> to vector<8x128xf32>
    %46 = vector.broadcast %44 : vector<1x128xf32> to vector<8x128xf32>
    %47 = arith.mulf %45, %46 : vector<8x128xf32>
    %48 = arith.addf %37, %47 : vector<8x128xf32>
    %c4_15 = arith.constant 4 : index
    %c0_16 = arith.constant 0 : index
    %49 = vector.load %arg3[%c4_15, %c0_16] : memref<16x128xf32, #tpu.memory_space<vmem>>, vector<1x128xf32>
    %50 = vector.broadcast %43 : vector<8x1xf32> to vector<8x128xf32>
    %51 = vector.broadcast %49 : vector<1x128xf32> to vector<8x128xf32>
    %52 = arith.mulf %50, %51 : vector<8x128xf32>
    %53 = arith.addf %42, %52 : vector<8x128xf32>
    %54 = vector.extract_strided_slice %0 {offsets = [0, 5], sizes = [8, 1], strides = [1, 1]} : vector<8x16xf32> to vector<8x1xf32>
    %c5 = arith.constant 5 : index
    %c0_17 = arith.constant 0 : index
    %55 = vector.load %arg2[%c5, %c0_17] : memref<16x128xf32, #tpu.memory_space<vmem>>, vector<1x128xf32>
    %56 = vector.broadcast %54 : vector<8x1xf32> to vector<8x128xf32>
    %57 = vector.broadcast %55 : vector<1x128xf32> to vector<8x128xf32>
    %58 = arith.mulf %56, %57 : vector<8x128xf32>
    %59 = arith.addf %48, %58 : vector<8x128xf32>
    %c5_18 = arith.constant 5 : index
    %c0_19 = arith.constant 0 : index
    %60 = vector.load %arg3[%c5_18, %c0_19] : memref<16x128xf32, #tpu.memory_space<vmem>>, vector<1x128xf32>
    %61 = vector.broadcast %54 : vector<8x1xf32> to vector<8x128xf32>
    %62 = vector.broadcast %60 : vector<1x128xf32> to vector<8x128xf32>
    %63 = arith.mulf %61, %62 : vector<8x128xf32>
    %64 = arith.addf %53, %63 : vector<8x128xf32>
    %65 = vector.extract_strided_slice %0 {offsets = [0, 6], sizes = [8, 1], strides = [1, 1]} : vector<8x16xf32> to vector<8x1xf32>
    %c6 = arith.constant 6 : index
    %c0_20 = arith.constant 0 : index
    %66 = vector.load %arg2[%c6, %c0_20] : memref<16x128xf32, #tpu.memory_space<vmem>>, vector<1x128xf32>
    %67 = vector.broadcast %65 : vector<8x1xf32> to vector<8x128xf32>
    %68 = vector.broadcast %66 : vector<1x128xf32> to vector<8x128xf32>
    %69 = arith.mulf %67, %68 : vector<8x128xf32>
    %70 = arith.addf %59, %69 : vector<8x128xf32>
    %c6_21 = arith.constant 6 : index
    %c0_22 = arith.constant 0 : index
    %71 = vector.load %arg3[%c6_21, %c0_22] : memref<16x128xf32, #tpu.memory_space<vmem>>, vector<1x128xf32>
    %72 = vector.broadcast %65 : vector<8x1xf32> to vector<8x128xf32>
    %73 = vector.broadcast %71 : vector<1x128xf32> to vector<8x128xf32>
    %74 = arith.mulf %72, %73 : vector<8x128xf32>
    %75 = arith.addf %64, %74 : vector<8x128xf32>
    %76 = vector.extract_strided_slice %0 {offsets = [0, 7], sizes = [8, 1], strides = [1, 1]} : vector<8x16xf32> to vector<8x1xf32>
    %c7 = arith.constant 7 : index
    %c0_23 = arith.constant 0 : index
    %77 = vector.load %arg2[%c7, %c0_23] : memref<16x128xf32, #tpu.memory_space<vmem>>, vector<1x128xf32>
    %78 = vector.broadcast %76 : vector<8x1xf32> to vector<8x128xf32>
    %79 = vector.broadcast %77 : vector<1x128xf32> to vector<8x128xf32>
    %80 = arith.mulf %78, %79 : vector<8x128xf32>
    %81 = arith.addf %70, %80 : vector<8x128xf32>
    %c7_24 = arith.constant 7 : index
    %c0_25 = arith.constant 0 : index
    %82 = vector.load %arg3[%c7_24, %c0_25] : memref<16x128xf32, #tpu.memory_space<vmem>>, vector<1x128xf32>
    %83 = vector.broadcast %76 : vector<8x1xf32> to vector<8x128xf32>
    %84 = vector.broadcast %82 : vector<1x128xf32> to vector<8x128xf32>
    %85 = arith.mulf %83, %84 : vector<8x128xf32>
    %86 = arith.addf %75, %85 : vector<8x128xf32>
    %87 = vector.extract_strided_slice %0 {offsets = [0, 8], sizes = [8, 1], strides = [1, 1]} : vector<8x16xf32> to vector<8x1xf32>
    %c8 = arith.constant 8 : index
    %c0_26 = arith.constant 0 : index
    %88 = vector.load %arg2[%c8, %c0_26] : memref<16x128xf32, #tpu.memory_space<vmem>>, vector<1x128xf32>
    %89 = vector.broadcast %87 : vector<8x1xf32> to vector<8x128xf32>
    %90 = vector.broadcast %88 : vector<1x128xf32> to vector<8x128xf32>
    %91 = arith.mulf %89, %90 : vector<8x128xf32>
    %92 = arith.addf %81, %91 : vector<8x128xf32>
    %c8_27 = arith.constant 8 : index
    %c0_28 = arith.constant 0 : index
    %93 = vector.load %arg3[%c8_27, %c0_28] : memref<16x128xf32, #tpu.memory_space<vmem>>, vector<1x128xf32>
    %94 = vector.broadcast %87 : vector<8x1xf32> to vector<8x128xf32>
    %95 = vector.broadcast %93 : vector<1x128xf32> to vector<8x128xf32>
    %96 = arith.mulf %94, %95 : vector<8x128xf32>
    %97 = arith.addf %86, %96 : vector<8x128xf32>
    %98 = vector.extract_strided_slice %0 {offsets = [0, 9], sizes = [8, 1], strides = [1, 1]} : vector<8x16xf32> to vector<8x1xf32>
    %c9 = arith.constant 9 : index
    %c0_29 = arith.constant 0 : index
    %99 = vector.load %arg2[%c9, %c0_29] : memref<16x128xf32, #tpu.memory_space<vmem>>, vector<1x128xf32>
    %100 = vector.broadcast %98 : vector<8x1xf32> to vector<8x128xf32>
    %101 = vector.broadcast %99 : vector<1x128xf32> to vector<8x128xf32>
    %102 = arith.mulf %100, %101 : vector<8x128xf32>
    %103 = arith.addf %92, %102 : vector<8x128xf32>
    %c9_30 = arith.constant 9 : index
    %c0_31 = arith.constant 0 : index
    %104 = vector.load %arg3[%c9_30, %c0_31] : memref<16x128xf32, #tpu.memory_space<vmem>>, vector<1x128xf32>
    %105 = vector.broadcast %98 : vector<8x1xf32> to vector<8x128xf32>
    %106 = vector.broadcast %104 : vector<1x128xf32> to vector<8x128xf32>
    %107 = arith.mulf %105, %106 : vector<8x128xf32>
    %108 = arith.addf %97, %107 : vector<8x128xf32>
    %109 = vector.extract_strided_slice %0 {offsets = [0, 10], sizes = [8, 1], strides = [1, 1]} : vector<8x16xf32> to vector<8x1xf32>
    %c10 = arith.constant 10 : index
    %c0_32 = arith.constant 0 : index
    %110 = vector.load %arg2[%c10, %c0_32] : memref<16x128xf32, #tpu.memory_space<vmem>>, vector<1x128xf32>
    %111 = vector.broadcast %109 : vector<8x1xf32> to vector<8x128xf32>
    %112 = vector.broadcast %110 : vector<1x128xf32> to vector<8x128xf32>
    %113 = arith.mulf %111, %112 : vector<8x128xf32>
    %114 = arith.addf %103, %113 : vector<8x128xf32>
    %c10_33 = arith.constant 10 : index
    %c0_34 = arith.constant 0 : index
    %115 = vector.load %arg3[%c10_33, %c0_34] : memref<16x128xf32, #tpu.memory_space<vmem>>, vector<1x128xf32>
    %116 = vector.broadcast %109 : vector<8x1xf32> to vector<8x128xf32>
    %117 = vector.broadcast %115 : vector<1x128xf32> to vector<8x128xf32>
    %118 = arith.mulf %116, %117 : vector<8x128xf32>
    %119 = arith.addf %108, %118 : vector<8x128xf32>
    %120 = vector.extract_strided_slice %0 {offsets = [0, 11], sizes = [8, 1], strides = [1, 1]} : vector<8x16xf32> to vector<8x1xf32>
    %c11 = arith.constant 11 : index
    %c0_35 = arith.constant 0 : index
    %121 = vector.load %arg2[%c11, %c0_35] : memref<16x128xf32, #tpu.memory_space<vmem>>, vector<1x128xf32>
    %122 = vector.broadcast %120 : vector<8x1xf32> to vector<8x128xf32>
    %123 = vector.broadcast %121 : vector<1x128xf32> to vector<8x128xf32>
    %124 = arith.mulf %122, %123 : vector<8x128xf32>
    %125 = arith.addf %114, %124 : vector<8x128xf32>
    %c11_36 = arith.constant 11 : index
    %c0_37 = arith.constant 0 : index
    %126 = vector.load %arg3[%c11_36, %c0_37] : memref<16x128xf32, #tpu.memory_space<vmem>>, vector<1x128xf32>
    %127 = vector.broadcast %120 : vector<8x1xf32> to vector<8x128xf32>
    %128 = vector.broadcast %126 : vector<1x128xf32> to vector<8x128xf32>
    %129 = arith.mulf %127, %128 : vector<8x128xf32>
    %130 = arith.addf %119, %129 : vector<8x128xf32>
    %131 = vector.extract_strided_slice %0 {offsets = [0, 12], sizes = [8, 1], strides = [1, 1]} : vector<8x16xf32> to vector<8x1xf32>
    %c12 = arith.constant 12 : index
    %c0_38 = arith.constant 0 : index
    %132 = vector.load %arg2[%c12, %c0_38] : memref<16x128xf32, #tpu.memory_space<vmem>>, vector<1x128xf32>
    %133 = vector.broadcast %131 : vector<8x1xf32> to vector<8x128xf32>
    %134 = vector.broadcast %132 : vector<1x128xf32> to vector<8x128xf32>
    %135 = arith.mulf %133, %134 : vector<8x128xf32>
    %136 = arith.addf %125, %135 : vector<8x128xf32>
    %c12_39 = arith.constant 12 : index
    %c0_40 = arith.constant 0 : index
    %137 = vector.load %arg3[%c12_39, %c0_40] : memref<16x128xf32, #tpu.memory_space<vmem>>, vector<1x128xf32>
    %138 = vector.broadcast %131 : vector<8x1xf32> to vector<8x128xf32>
    %139 = vector.broadcast %137 : vector<1x128xf32> to vector<8x128xf32>
    %140 = arith.mulf %138, %139 : vector<8x128xf32>
    %141 = arith.addf %130, %140 : vector<8x128xf32>
    %142 = vector.extract_strided_slice %0 {offsets = [0, 13], sizes = [8, 1], strides = [1, 1]} : vector<8x16xf32> to vector<8x1xf32>
    %c13 = arith.constant 13 : index
    %c0_41 = arith.constant 0 : index
    %143 = vector.load %arg2[%c13, %c0_41] : memref<16x128xf32, #tpu.memory_space<vmem>>, vector<1x128xf32>
    %144 = vector.broadcast %142 : vector<8x1xf32> to vector<8x128xf32>
    %145 = vector.broadcast %143 : vector<1x128xf32> to vector<8x128xf32>
    %146 = arith.mulf %144, %145 : vector<8x128xf32>
    %147 = arith.addf %136, %146 : vector<8x128xf32>
    %c13_42 = arith.constant 13 : index
    %c0_43 = arith.constant 0 : index
    %148 = vector.load %arg3[%c13_42, %c0_43] : memref<16x128xf32, #tpu.memory_space<vmem>>, vector<1x128xf32>
    %149 = vector.broadcast %142 : vector<8x1xf32> to vector<8x128xf32>
    %150 = vector.broadcast %148 : vector<1x128xf32> to vector<8x128xf32>
    %151 = arith.mulf %149, %150 : vector<8x128xf32>
    %152 = arith.addf %141, %151 : vector<8x128xf32>
    %153 = vector.extract_strided_slice %0 {offsets = [0, 14], sizes = [8, 1], strides = [1, 1]} : vector<8x16xf32> to vector<8x1xf32>
    %c14 = arith.constant 14 : index
    %c0_44 = arith.constant 0 : index
    %154 = vector.load %arg2[%c14, %c0_44] : memref<16x128xf32, #tpu.memory_space<vmem>>, vector<1x128xf32>
    %155 = vector.broadcast %153 : vector<8x1xf32> to vector<8x128xf32>
    %156 = vector.broadcast %154 : vector<1x128xf32> to vector<8x128xf32>
    %157 = arith.mulf %155, %156 : vector<8x128xf32>
    %158 = arith.addf %147, %157 : vector<8x128xf32>
    %c14_45 = arith.constant 14 : index
    %c0_46 = arith.constant 0 : index
    %159 = vector.load %arg3[%c14_45, %c0_46] : memref<16x128xf32, #tpu.memory_space<vmem>>, vector<1x128xf32>
    %160 = vector.broadcast %153 : vector<8x1xf32> to vector<8x128xf32>
    %161 = vector.broadcast %159 : vector<1x128xf32> to vector<8x128xf32>
    %162 = arith.mulf %160, %161 : vector<8x128xf32>
    %163 = arith.addf %152, %162 : vector<8x128xf32>
    %164 = vector.extract_strided_slice %0 {offsets = [0, 15], sizes = [8, 1], strides = [1, 1]} : vector<8x16xf32> to vector<8x1xf32>
    %c15 = arith.constant 15 : index
    %c0_47 = arith.constant 0 : index
    %165 = vector.load %arg2[%c15, %c0_47] : memref<16x128xf32, #tpu.memory_space<vmem>>, vector<1x128xf32>
    %166 = vector.broadcast %164 : vector<8x1xf32> to vector<8x128xf32>
    %167 = vector.broadcast %165 : vector<1x128xf32> to vector<8x128xf32>
    %168 = arith.mulf %166, %167 : vector<8x128xf32>
    %169 = arith.addf %158, %168 : vector<8x128xf32>
    %c15_48 = arith.constant 15 : index
    %c0_49 = arith.constant 0 : index
    %170 = vector.load %arg3[%c15_48, %c0_49] : memref<16x128xf32, #tpu.memory_space<vmem>>, vector<1x128xf32>
    %171 = vector.broadcast %164 : vector<8x1xf32> to vector<8x128xf32>
    %172 = vector.broadcast %170 : vector<1x128xf32> to vector<8x128xf32>
    %173 = arith.mulf %171, %172 : vector<8x128xf32>
    %174 = arith.addf %163, %173 : vector<8x128xf32>
    %175 = arith.mulf %169, %169 : vector<8x128xf32>
    %176 = arith.mulf %174, %174 : vector<8x128xf32>
    %177 = arith.addf %175, %176 : vector<8x128xf32>
    %c0_50 = arith.constant 0 : index
    %c0_51 = arith.constant 0 : index
    %178 = vector.load %arg5[%c0_50, %c0_51] : memref<1x128xf32, #tpu.memory_space<vmem>>, vector<1x128xf32>
    %179 = vector.broadcast %178 : vector<1x128xf32> to vector<8x128xf32>
    %180 = arith.addf %177, %179 : vector<8x128xf32>
    %181 = math.log %180 : vector<8x128xf32>
    %c0_52 = arith.constant 0 : index
    %c0_53 = arith.constant 0 : index
    %182 = vector.load %arg4[%c0_52, %c0_53] : memref<128x8xf32, #tpu.memory_space<vmem>>, vector<128x8xf32>
    %cst = arith.constant dense<0.000000e+00> : vector<8x8xf32>
    %183 = tpu.matmul %181, %182, %cst {dimension_numbers = #tpu.dot_dimension_numbers<[1], [0], [0], [1], [0, 0, 1, 1], [], []>} : vector<8x128xf32>, vector<128x8xf32>, vector<8x8xf32> -> vector<8x8xf32>
    %c0_54 = arith.constant 0 : index
    %c0_55 = arith.constant 0 : index
    %184 = vector.load %arg6[%c0_54, %c0_55] : memref<8x8xf32, #tpu.memory_space<vmem>>, vector<8x8xf32>
    tpu.vector_store %arg6[%c0_54, %c0_55], %183 {strides = array<i32>} : memref<8x8xf32, #tpu.memory_space<vmem>>, vector<8x8xf32>,
    return
  }
  func.func @transform_0(%arg0: i32) -> (i32, i32) {
    %c0_i32 = arith.constant 0 : i32
    %c0_i32_0 = arith.constant 0 : i32
    return %arg0, %c0_i32 : i32, i32
  }
  func.func @transform_1(%arg0: i32) -> (i32, i32) {
    %c0_i32 = arith.constant 0 : i32
    %c0_i32_0 = arith.constant 0 : i32
    %c0_i32_1 = arith.constant 0 : i32
    return %c0_i32, %c0_i32_0 : i32, i32
  }
  func.func @transform_2(%arg0: i32) -> (i32, i32) {
    %c0_i32 = arith.constant 0 : i32
    %c0_i32_0 = arith.constant 0 : i32
    %c0_i32_1 = arith.constant 0 : i32
    return %c0_i32, %c0_i32_0 : i32, i32
  }
  func.func @transform_3(%arg0: i32) -> (i32, i32) {
    %c0_i32 = arith.constant 0 : i32
    %c0_i32_0 = arith.constant 0 : i32
    %c0_i32_1 = arith.constant 0 : i32
    return %c0_i32, %c0_i32_0 : i32, i32
  }
  func.func @transform_4(%arg0: i32) -> (i32, i32) {
    %c0_i32 = arith.constant 0 : i32
    %c0_i32_0 = arith.constant 0 : i32
    %c0_i32_1 = arith.constant 0 : i32
    return %c0_i32, %c0_i32_0 : i32, i32
  }
  func.func @transform_5(%arg0: i32) -> (i32, i32) {
    %c0_i32 = arith.constant 0 : i32
    %c0_i32_0 = arith.constant 0 : i32
    return %arg0, %c0_i32 : i32, i32
  }
}

module attributes {stable_mosaic.version = 11 : i64} {
  func.func @_mpir2c_kernel(%arg0: i32, %arg1: memref<8x16xf32, #tpu.memory_space<vmem>>, %arg2: memref<16x128xf32, #tpu.memory_space<vmem>>, %arg3: memref<16x128xf32, #tpu.memory_space<vmem>>, %arg4: memref<128x8xf32, #tpu.memory_space<vmem>>, %arg5: memref<1x128xf32, #tpu.memory_space<vmem>>, %arg6: memref<8x8xf32, #tpu.memory_space<vmem>>) attributes {dimension_semantics = [#tpu.dimension_semantics<parallel>], iteration_bounds = array<i64: 1>, scalar_prefetch = 0 : i64, scratch_operands = 0 : i64, tpu.core_type = #tpu.core_type<tc>, window_params = [{transform_indices = @transform_0, window_bounds = array<i64: 8, 16>}, {pipeline_mode = #tpu.pipeline_mode<synchronous>, transform_indices = @transform_1, window_bounds = array<i64: 16, 128>}, {pipeline_mode = #tpu.pipeline_mode<synchronous>, transform_indices = @transform_2, window_bounds = array<i64: 16, 128>}, {pipeline_mode = #tpu.pipeline_mode<synchronous>, transform_indices = @transform_3, window_bounds = array<i64: 128, 8>}, {pipeline_mode = #tpu.pipeline_mode<synchronous>, transform_indices = @transform_4, window_bounds = array<i64: 1, 128>}, {transform_indices = @transform_5, window_bounds = array<i64: 8, 8>}]} {
    %c0 = arith.constant 0 : index
    %c0_0 = arith.constant 0 : index
    %0 = vector.load %arg1[%c0, %c0_0] : memref<8x16xf32, #tpu.memory_space<vmem>>, vector<8x16xf32>
    %1 = vector.extract_strided_slice %0 {offsets = [0, 0], sizes = [8, 1], strides = [1, 1]} : vector<8x16xf32> to vector<8x1xf32>
    %c0_1 = arith.constant 0 : index
    %c0_2 = arith.constant 0 : index
    %2 = vector.load %arg2[%c0_1, %c0_2] : memref<16x128xf32, #tpu.memory_space<vmem>>, vector<1x128xf32>
    %3 = vector.broadcast %1 : vector<8x1xf32> to vector<8x128xf32>
    %4 = vector.broadcast %2 : vector<1x128xf32> to vector<8x128xf32>
    %5 = arith.mulf %3, %4 : vector<8x128xf32>
    %c0_3 = arith.constant 0 : index
    %c0_4 = arith.constant 0 : index
    %6 = vector.load %arg3[%c0_3, %c0_4] : memref<16x128xf32, #tpu.memory_space<vmem>>, vector<1x128xf32>
    %7 = vector.broadcast %1 : vector<8x1xf32> to vector<8x128xf32>
    %8 = vector.broadcast %6 : vector<1x128xf32> to vector<8x128xf32>
    %9 = arith.mulf %7, %8 : vector<8x128xf32>
    %10 = vector.extract_strided_slice %0 {offsets = [0, 1], sizes = [8, 1], strides = [1, 1]} : vector<8x16xf32> to vector<8x1xf32>
    %c1 = arith.constant 1 : index
    %c0_5 = arith.constant 0 : index
    %11 = vector.load %arg2[%c1, %c0_5] : memref<16x128xf32, #tpu.memory_space<vmem>>, vector<1x128xf32>
    %12 = vector.broadcast %10 : vector<8x1xf32> to vector<8x128xf32>
    %13 = vector.broadcast %11 : vector<1x128xf32> to vector<8x128xf32>
    %14 = arith.mulf %12, %13 : vector<8x128xf32>
    %15 = arith.addf %5, %14 : vector<8x128xf32>
    %c1_6 = arith.constant 1 : index
    %c0_7 = arith.constant 0 : index
    %16 = vector.load %arg3[%c1_6, %c0_7] : memref<16x128xf32, #tpu.memory_space<vmem>>, vector<1x128xf32>
    %17 = vector.broadcast %10 : vector<8x1xf32> to vector<8x128xf32>
    %18 = vector.broadcast %16 : vector<1x128xf32> to vector<8x128xf32>
    %19 = arith.mulf %17, %18 : vector<8x128xf32>
    %20 = arith.addf %9, %19 : vector<8x128xf32>
    %21 = vector.extract_strided_slice %0 {offsets = [0, 2], sizes = [8, 1], strides = [1, 1]} : vector<8x16xf32> to vector<8x1xf32>
    %c2 = arith.constant 2 : index
    %c0_8 = arith.constant 0 : index
    %22 = vector.load %arg2[%c2, %c0_8] : memref<16x128xf32, #tpu.memory_space<vmem>>, vector<1x128xf32>
    %23 = vector.broadcast %21 : vector<8x1xf32> to vector<8x128xf32>
    %24 = vector.broadcast %22 : vector<1x128xf32> to vector<8x128xf32>
    %25 = arith.mulf %23, %24 : vector<8x128xf32>
    %26 = arith.addf %15, %25 : vector<8x128xf32>
    %c2_9 = arith.constant 2 : index
    %c0_10 = arith.constant 0 : index
    %27 = vector.load %arg3[%c2_9, %c0_10] : memref<16x128xf32, #tpu.memory_space<vmem>>, vector<1x128xf32>
    %28 = vector.broadcast %21 : vector<8x1xf32> to vector<8x128xf32>
    %29 = vector.broadcast %27 : vector<1x128xf32> to vector<8x128xf32>
    %30 = arith.mulf %28, %29 : vector<8x128xf32>
    %31 = arith.addf %20, %30 : vector<8x128xf32>
    %32 = vector.extract_strided_slice %0 {offsets = [0, 3], sizes = [8, 1], strides = [1, 1]} : vector<8x16xf32> to vector<8x1xf32>
    %c3 = arith.constant 3 : index
    %c0_11 = arith.constant 0 : index
    %33 = vector.load %arg2[%c3, %c0_11] : memref<16x128xf32, #tpu.memory_space<vmem>>, vector<1x128xf32>
    %34 = vector.broadcast %32 : vector<8x1xf32> to vector<8x128xf32>
    %35 = vector.broadcast %33 : vector<1x128xf32> to vector<8x128xf32>
    %36 = arith.mulf %34, %35 : vector<8x128xf32>
    %37 = arith.addf %26, %36 : vector<8x128xf32>
    %c3_12 = arith.constant 3 : index
    %c0_13 = arith.constant 0 : index
    %38 = vector.load %arg3[%c3_12, %c0_13] : memref<16x128xf32, #tpu.memory_space<vmem>>, vector<1x128xf32>
    %39 = vector.broadcast %32 : vector<8x1xf32> to vector<8x128xf32>
    %40 = vector.broadcast %38 : vector<1x128xf32> to vector<8x128xf32>
    %41 = arith.mulf %39, %40 : vector<8x128xf32>
    %42 = arith.addf %31, %41 : vector<8x128xf32>
    %43 = vector.extract_strided_slice %0 {offsets = [0, 4], sizes = [8, 1], strides = [1, 1]} : vector<8x16xf32> to vector<8x1xf32>
    %c4 = arith.constant 4 : index
    %c0_14 = arith.constant 0 : index
    %44 = vector.load %arg2[%c4, %c0_14] : memref<16x128xf32, #tpu.memory_space<vmem>>, vector<1x128xf32>
    %45 = vector.broadcast %43 : vector<8x1xf32> to vector<8x128xf32>
    %46 = vector.broadcast %44 : vector<1x128xf32> to vector<8x128xf32>
    %47 = arith.mulf %45, %46 : vector<8x128xf32>
    %48 = arith.addf %37, %47 : vector<8x128xf32>
    %c4_15 = arith.constant 4 : index
    %c0_16 = arith.constant 0 : index
    %49 = vector.load %arg3[%c4_15, %c0_16] : memref<16x128xf32, #tpu.memory_space<vmem>>, vector<1x128xf32>
    %50 = vector.broadcast %43 : vector<8x1xf32> to vector<8x128xf32>
    %51 = vector.broadcast %49 : vector<1x128xf32> to vector<8x128xf32>
    %52 = arith.mulf %50, %51 : vector<8x128xf32>
    %53 = arith.addf %42, %52 : vector<8x128xf32>
    %54 = vector.extract_strided_slice %0 {offsets = [0, 5], sizes = [8, 1], strides = [1, 1]} : vector<8x16xf32> to vector<8x1xf32>
    %c5 = arith.constant 5 : index
    %c0_17 = arith.constant 0 : index
    %55 = vector.load %arg2[%c5, %c0_17] : memref<16x128xf32, #tpu.memory_space<vmem>>, vector<1x128xf32>
    %56 = vector.broadcast %54 : vector<8x1xf32> to vector<8x128xf32>
    %57 = vector.broadcast %55 : vector<1x128xf32> to vector<8x128xf32>
    %58 = arith.mulf %56, %57 : vector<8x128xf32>
    %59 = arith.addf %48, %58 : vector<8x128xf32>
    %c5_18 = arith.constant 5 : index
    %c0_19 = arith.constant 0 : index
    %60 = vector.load %arg3[%c5_18, %c0_19] : memref<16x128xf32, #tpu.memory_space<vmem>>, vector<1x128xf32>
    %61 = vector.broadcast %54 : vector<8x1xf32> to vector<8x128xf32>
    %62 = vector.broadcast %60 : vector<1x128xf32> to vector<8x128xf32>
    %63 = arith.mulf %61, %62 : vector<8x128xf32>
    %64 = arith.addf %53, %63 : vector<8x128xf32>
    %65 = vector.extract_strided_slice %0 {offsets = [0, 6], sizes = [8, 1], strides = [1, 1]} : vector<8x16xf32> to vector<8x1xf32>
    %c6 = arith.constant 6 : index
    %c0_20 = arith.constant 0 : index
    %66 = vector.load %arg2[%c6, %c0_20] : memref<16x128xf32, #tpu.memory_space<vmem>>, vector<1x128xf32>
    %67 = vector.broadcast %65 : vector<8x1xf32> to vector<8x128xf32>
    %68 = vector.broadcast %66 : vector<1x128xf32> to vector<8x128xf32>
    %69 = arith.mulf %67, %68 : vector<8x128xf32>
    %70 = arith.addf %59, %69 : vector<8x128xf32>
    %c6_21 = arith.constant 6 : index
    %c0_22 = arith.constant 0 : index
    %71 = vector.load %arg3[%c6_21, %c0_22] : memref<16x128xf32, #tpu.memory_space<vmem>>, vector<1x128xf32>
    %72 = vector.broadcast %65 : vector<8x1xf32> to vector<8x128xf32>
    %73 = vector.broadcast %71 : vector<1x128xf32> to vector<8x128xf32>
    %74 = arith.mulf %72, %73 : vector<8x128xf32>
    %75 = arith.addf %64, %74 : vector<8x128xf32>
    %76 = vector.extract_strided_slice %0 {offsets = [0, 7], sizes = [8, 1], strides = [1, 1]} : vector<8x16xf32> to vector<8x1xf32>
    %c7 = arith.constant 7 : index
    %c0_23 = arith.constant 0 : index
    %77 = vector.load %arg2[%c7, %c0_23] : memref<16x128xf32, #tpu.memory_space<vmem>>, vector<1x128xf32>
    %78 = vector.broadcast %76 : vector<8x1xf32> to vector<8x128xf32>
    %79 = vector.broadcast %77 : vector<1x128xf32> to vector<8x128xf32>
    %80 = arith.mulf %78, %79 : vector<8x128xf32>
    %81 = arith.addf %70, %80 : vector<8x128xf32>
    %c7_24 = arith.constant 7 : index
    %c0_25 = arith.constant 0 : index
    %82 = vector.load %arg3[%c7_24, %c0_25] : memref<16x128xf32, #tpu.memory_space<vmem>>, vector<1x128xf32>
    %83 = vector.broadcast %76 : vector<8x1xf32> to vector<8x128xf32>
    %84 = vector.broadcast %82 : vector<1x128xf32> to vector<8x128xf32>
    %85 = arith.mulf %83, %84 : vector<8x128xf32>
    %86 = arith.addf %75, %85 : vector<8x128xf32>
    %87 = vector.extract_strided_slice %0 {offsets = [0, 8], sizes = [8, 1], strides = [1, 1]} : vector<8x16xf32> to vector<8x1xf32>
    %c8 = arith.constant 8 : index
    %c0_26 = arith.constant 0 : index
    %88 = vector.load %arg2[%c8, %c0_26] : memref<16x128xf32, #tpu.memory_space<vmem>>, vector<1x128xf32>
    %89 = vector.broadcast %87 : vector<8x1xf32> to vector<8x128xf32>
    %90 = vector.broadcast %88 : vector<1x128xf32> to vector<8x128xf32>
    %91 = arith.mulf %89, %90 : vector<8x128xf32>
    %92 = arith.addf %81, %91 : vector<8x128xf32>
    %c8_27 = arith.constant 8 : index
    %c0_28 = arith.constant 0 : index
    %93 = vector.load %arg3[%c8_27, %c0_28] : memref<16x128xf32, #tpu.memory_space<vmem>>, vector<1x128xf32>
    %94 = vector.broadcast %87 : vector<8x1xf32> to vector<8x128xf32>
    %95 = vector.broadcast %93 : vector<1x128xf32> to vector<8x128xf32>
    %96 = arith.mulf %94, %95 : vector<8x128xf32>
    %97 = arith.addf %86, %96 : vector<8x128xf32>
    %98 = vector.extract_strided_slice %0 {offsets = [0, 9], sizes = [8, 1], strides = [1, 1]} : vector<8x16xf32> to vector<8x1xf32>
    %c9 = arith.constant 9 : index
    %c0_29 = arith.constant 0 : index
    %99 = vector.load %arg2[%c9, %c0_29] : memref<16x128xf32, #tpu.memory_space<vmem>>, vector<1x128xf32>
    %100 = vector.broadcast %98 : vector<8x1xf32> to vector<8x128xf32>
    %101 = vector.broadcast %99 : vector<1x128xf32> to vector<8x128xf32>
    %102 = arith.mulf %100, %101 : vector<8x128xf32>
    %103 = arith.addf %92, %102 : vector<8x128xf32>
    %c9_30 = arith.constant 9 : index
    %c0_31 = arith.constant 0 : index
    %104 = vector.load %arg3[%c9_30, %c0_31] : memref<16x128xf32, #tpu.memory_space<vmem>>, vector<1x128xf32>
    %105 = vector.broadcast %98 : vector<8x1xf32> to vector<8x128xf32>
    %106 = vector.broadcast %104 : vector<1x128xf32> to vector<8x128xf32>
    %107 = arith.mulf %105, %106 : vector<8x128xf32>
    %108 = arith.addf %97, %107 : vector<8x128xf32>
    %109 = vector.extract_strided_slice %0 {offsets = [0, 10], sizes = [8, 1], strides = [1, 1]} : vector<8x16xf32> to vector<8x1xf32>
    %c10 = arith.constant 10 : index
    %c0_32 = arith.constant 0 : index
    %110 = vector.load %arg2[%c10, %c0_32] : memref<16x128xf32, #tpu.memory_space<vmem>>, vector<1x128xf32>
    %111 = vector.broadcast %109 : vector<8x1xf32> to vector<8x128xf32>
    %112 = vector.broadcast %110 : vector<1x128xf32> to vector<8x128xf32>
    %113 = arith.mulf %111, %112 : vector<8x128xf32>
    %114 = arith.addf %103, %113 : vector<8x128xf32>
    %c10_33 = arith.constant 10 : index
    %c0_34 = arith.constant 0 : index
    %115 = vector.load %arg3[%c10_33, %c0_34] : memref<16x128xf32, #tpu.memory_space<vmem>>, vector<1x128xf32>
    %116 = vector.broadcast %109 : vector<8x1xf32> to vector<8x128xf32>
    %117 = vector.broadcast %115 : vector<1x128xf32> to vector<8x128xf32>
    %118 = arith.mulf %116, %117 : vector<8x128xf32>
    %119 = arith.addf %108, %118 : vector<8x128xf32>
    %120 = vector.extract_strided_slice %0 {offsets = [0, 11], sizes = [8, 1], strides = [1, 1]} : vector<8x16xf32> to vector<8x1xf32>
    %c11 = arith.constant 11 : index
    %c0_35 = arith.constant 0 : index
    %121 = vector.load %arg2[%c11, %c0_35] : memref<16x128xf32, #tpu.memory_space<vmem>>, vector<1x128xf32>
    %122 = vector.broadcast %120 : vector<8x1xf32> to vector<8x128xf32>
    %123 = vector.broadcast %121 : vector<1x128xf32> to vector<8x128xf32>
    %124 = arith.mulf %122, %123 : vector<8x128xf32>
    %125 = arith.addf %114, %124 : vector<8x128xf32>
    %c11_36 = arith.constant 11 : index
    %c0_37 = arith.constant 0 : index
    %126 = vector.load %arg3[%c11_36, %c0_37] : memref<16x128xf32, #tpu.memory_space<vmem>>, vector<1x128xf32>
    %127 = vector.broadcast %120 : vector<8x1xf32> to vector<8x128xf32>
    %128 = vector.broadcast %126 : vector<1x128xf32> to vector<8x128xf32>
    %129 = arith.mulf %127, %128 : vector<8x128xf32>
    %130 = arith.addf %119, %129 : vector<8x128xf32>
    %131 = vector.extract_strided_slice %0 {offsets = [0, 12], sizes = [8, 1], strides = [1, 1]} : vector<8x16xf32> to vector<8x1xf32>
    %c12 = arith.constant 12 : index
    %c0_38 = arith.constant 0 : index
    %132 = vector.load %arg2[%c12, %c0_38] : memref<16x128xf32, #tpu.memory_space<vmem>>, vector<1x128xf32>
    %133 = vector.broadcast %131 : vector<8x1xf32> to vector<8x128xf32>
    %134 = vector.broadcast %132 : vector<1x128xf32> to vector<8x128xf32>
    %135 = arith.mulf %133, %134 : vector<8x128xf32>
    %136 = arith.addf %125, %135 : vector<8x128xf32>
    %c12_39 = arith.constant 12 : index
    %c0_40 = arith.constant 0 : index
    %137 = vector.load %arg3[%c12_39, %c0_40] : memref<16x128xf32, #tpu.memory_space<vmem>>, vector<1x128xf32>
    %138 = vector.broadcast %131 : vector<8x1xf32> to vector<8x128xf32>
    %139 = vector.broadcast %137 : vector<1x128xf32> to vector<8x128xf32>
    %140 = arith.mulf %138, %139 : vector<8x128xf32>
    %141 = arith.addf %130, %140 : vector<8x128xf32>
    %142 = vector.extract_strided_slice %0 {offsets = [0, 13], sizes = [8, 1], strides = [1, 1]} : vector<8x16xf32> to vector<8x1xf32>
    %c13 = arith.constant 13 : index
    %c0_41 = arith.constant 0 : index
    %143 = vector.load %arg2[%c13, %c0_41] : memref<16x128xf32, #tpu.memory_space<vmem>>, vector<1x128xf32>
    %144 = vector.broadcast %142 : vector<8x1xf32> to vector<8x128xf32>
    %145 = vector.broadcast %143 : vector<1x128xf32> to vector<8x128xf32>
    %146 = arith.mulf %144, %145 : vector<8x128xf32>
    %147 = arith.addf %136, %146 : vector<8x128xf32>
    %c13_42 = arith.constant 13 : index
    %c0_43 = arith.constant 0 : index
    %148 = vector.load %arg3[%c13_42, %c0_43] : memref<16x128xf32, #tpu.memory_space<vmem>>, vector<1x128xf32>
    %149 = vector.broadcast %142 : vector<8x1xf32> to vector<8x128xf32>
    %150 = vector.broadcast %148 : vector<1x128xf32> to vector<8x128xf32>
    %151 = arith.mulf %149, %150 : vector<8x128xf32>
    %152 = arith.addf %141, %151 : vector<8x128xf32>
    %153 = vector.extract_strided_slice %0 {offsets = [0, 14], sizes = [8, 1], strides = [1, 1]} : vector<8x16xf32> to vector<8x1xf32>
    %c14 = arith.constant 14 : index
    %c0_44 = arith.constant 0 : index
    %154 = vector.load %arg2[%c14, %c0_44] : memref<16x128xf32, #tpu.memory_space<vmem>>, vector<1x128xf32>
    %155 = vector.broadcast %153 : vector<8x1xf32> to vector<8x128xf32>
    %156 = vector.broadcast %154 : vector<1x128xf32> to vector<8x128xf32>
    %157 = arith.mulf %155, %156 : vector<8x128xf32>
    %158 = arith.addf %147, %157 : vector<8x128xf32>
    %c14_45 = arith.constant 14 : index
    %c0_46 = arith.constant 0 : index
    %159 = vector.load %arg3[%c14_45, %c0_46] : memref<16x128xf32, #tpu.memory_space<vmem>>, vector<1x128xf32>
    %160 = vector.broadcast %153 : vector<8x1xf32> to vector<8x128xf32>
    %161 = vector.broadcast %159 : vector<1x128xf32> to vector<8x128xf32>
    %162 = arith.mulf %160, %161 : vector<8x128xf32>
    %163 = arith.addf %152, %162 : vector<8x128xf32>
    %164 = vector.extract_strided_slice %0 {offsets = [0, 15], sizes = [8, 1], strides = [1, 1]} : vector<8x16xf32> to vector<8x1xf32>
    %c15 = arith.constant 15 : index
    %c0_47 = arith.constant 0 : index
    %165 = vector.load %arg2[%c15, %c0_47] : memref<16x128xf32, #tpu.memory_space<vmem>>, vector<1x128xf32>
    %166 = vector.broadcast %164 : vector<8x1xf32> to vector<8x128xf32>
    %167 = vector.broadcast %165 : vector<1x128xf32> to vector<8x128xf32>
    %168 = arith.mulf %166, %167 : vector<8x128xf32>
    %169 = arith.addf %158, %168 : vector<8x128xf32>
    %c15_48 = arith.constant 15 : index
    %c0_49 = arith.constant 0 : index
    %170 = vector.load %arg3[%c15_48, %c0_49] : memref<16x128xf32, #tpu.memory_space<vmem>>, vector<1x128xf32>
    %171 = vector.broadcast %164 : vector<8x1xf32> to vector<8x128xf32>
    %172 = vector.broadcast %170 : vector<1x128xf32> to vector<8x128xf32>
    %173 = arith.mulf %171, %172 : vector<8x128xf32>
    %174 = arith.addf %163, %173 : vector<8x128xf32>
    %175 = arith.mulf %169, %169 : vector<8x128xf32>
    %176 = arith.mulf %174, %174 : vector<8x128xf32>
    %177 = arith.addf %175, %176 : vector<8x128xf32>
    %c0_50 = arith.constant 0 : index
    %c0_51 = arith.constant 0 : index
    %178 = vector.load %arg5[%c0_50, %c0_51] : memref<1x128xf32, #tpu.memory_space<vmem>>, vector<1x128xf32>
    %179 = vector.broadcast %178 : vector<1x128xf32> to vector<8x128xf32>
    %180 = arith.addf %177, %179 : vector<8x128xf32>
    %181 = math.log %180 : vector<8x128xf32>
    %c0_52 = arith.constant 0 : index
    %c0_53 = arith.constant 0 : index
    %182 = vector.load %arg4[%c0_52, %c0_53] : memref<128x8xf32, #tpu.memory_space<vmem>>, vector<128x8xf32>
    %cst = arith.constant dense<0.000000e+00> : vector<8x8xf32>
    %183 = tpu.matmul %181, %182, %cst {dimension_numbers = #tpu.dot_dimension_numbers<[1], [0], [0], [1], [0, 0, 1, 1], [], []>} : vector<8x128xf32>, vector<128x8xf32>, vector<8x8xf32> -> vector<8x8xf32>
    %c0_54 = arith.constant 0 : index
    %c0_55 = arith.constant 0 : index
    %184 = vector.load %arg6[%c0_54, %c0_55] : memref<8x8xf32, #tpu.memory_space<vmem>>, vector<8x8xf32>
    tpu.vector_store %arg6[%c0_54, %c0_55], %183 {strides = array<i32>} : memref<8x8xf32, #tpu.memory_space<vmem>>, vector<8x8xf32>,
    return
  }
  func.func @transform_0(%arg0: i32) -> (i32, i32) {
    %c0_i32 = arith.constant 0 : i32
    %c0_i32_0 = arith.constant 0 : i32
    return %arg0, %c0_i32 : i32, i32
  }
  func.func @transform_1(%arg0: i32) -> (i32, i32) {
    %c0_i32 = arith.constant 0 : i32
    %c0_i32_0 = arith.constant 0 : i32
    %c0_i32_1 = arith.constant 0 : i32
    return %c0_i32, %c0_i32_0 : i32, i32
  }
  func.func @transform_2(%arg0: i32) -> (i32, i32) {
    %c0_i32 = arith.constant 0 : i32
    %c0_i32_0 = arith.constant 0 : i32
    %c0_i32_1 = arith.constant 0 : i32
    return %c0_i32, %c0_i32_0 : i32, i32
  }
  func.func @transform_3(%arg0: i32) -> (i32, i32) {
    %c0_i32 = arith.constant 0 : i32
    %c0_i32_0 = arith.constant 0 : i32
    %c0_i32_1 = arith.constant 0 : i32
    return %c0_i32, %c0_i32_0 : i32, i32
  }
  func.func @transform_4(%arg0: i32) -> (i32, i32) {
    %c0_i32 = arith.constant 0 : i32
    %c0_i32_0 = arith.constant 0 : i32
    %c0_i32_1 = arith.constant 0 : i32
    return %c0_i32, %c0_i32_0 : i32, i32
  }
  func.func @transform_5(%arg0: i32) -> (i32, i32) {
    %c0_i32 = arith.constant 0 : i32
    %c0_i32_0 = arith.constant 0 : i32
    return %arg0, %c0_i32 : i32, i32
  }
}

</mosaic_0001>

<bundles_post_ra>
// kernel: tpu_custom_call.1
= control target key start
LH: loop header
LB: loop body
LE: loop exit
PB: predicated region body
PF: predicated region fallthrough
CT: control target
= control target key end

     0   :  { %v596_v1 = vmov 2   ;;  %v597_v2 = vmov 0   ;;  %s826_s0 = inlined_call_operand.vmem [shape: f32[8,16], index: 0, kind: input, shape index: {}]   ;;  %s827_s1 = inlined_call_operand.vmem [shape: f32[16,128], index: 1, kind: input, shape index: {}]   ;;  %s828_s2 = inlined_call_operand.vmem [shape: f32[16,128], index: 2, kind: input, shape index: {}]   ;;  %s829_s3 = inlined_call_operand.vmem [shape: f32[128,8], index: 3, kind: input, shape index: {}]   ;;  %s830_s4 = inlined_call_operand.vmem [shape: f32[1,128], index: 4, kind: input, shape index: {}]   ;;  %s831_s5 = inlined_call_operand.hbm [shape: f32[8,8], index: 5, kind: output, shape index: {}]  }
   0x1   :  { %v649_v0 = vld [vmem:[%s826_s0] sm:$0xff]  ;;  %555 = vset.pattern.permute.xlu1 %v596_v1  ;;  %553 = vset.pattern.permute.xlu0 %v597_v2 }
   0x2   :  { %59 = vperm.xlu1 %555, %v649_v0   ;;  %25 = vperm.xlu0 %553, %v649_v0  }
   0x3   :  { %10 = vsyncpa [#allocation3], 0  ;;  %v598_v3 = vmov 3   ;;  %v599_v4 = vmov 1   ;;  %v600_v5 = vmov 4   ;;  %v601_v6 = vmov 5  }
   0x4   :  { %v602_v7 = vmov 6   ;;  %v603_v8 = vmov 8   ;;  %v604_v9 = vmov 7   ;;  %v605_v10 = vmov 11   ;;  %v322_v16 = vld [vmem:[%s829_s3] sm:$0xff]  ;;  %v323_v17 = vld [vmem:[%s829_s3 + $0x8] sm:$0xff] }
   0x5   :  { %v606_v11 = vmov 9   ;;  %v607_v12 = vmov 14   ;;  %v608_v13 = vmov 10   ;;  %v609_v14 = vmov 15   ;;  %v324_v20 = vld [vmem:[%s829_s3 + $0x10] sm:$0xff]  ;;  %v325_v21 = vld [vmem:[%s829_s3 + $0x18] sm:$0xff] }
   0x6   :  { %556 = vset.pattern.permute.xlu1 %v598_v3  ;;  %554 = vset.pattern.permute.xlu0 %v599_v4  ;;  %v610_v15 = vmov 12   ;;  %v611_v18 = vmov 0.0|0.0   ;;  %v510_v19 = vpack.c.bf16 %v323_v17, %v322_v16  ;;  %v612_v22 = vmov 13   ;;  %v326_v24 = vld [vmem:[%s829_s3 + $0x20] sm:$0xff]  ;;  %v327_v25 = vld [vmem:[%s829_s3 + $0x28] sm:$0xff]  ;;  %v328_v27 = vld [vmem:[%s829_s3 + $0x30] sm:$0xff] }
   0x7   :  { %77 = vperm.xlu1 %556, %v649_v0   ;;  %41 = vperm.xlu0 %554, %v649_v0   ;;  %v513_v23 = vpack.c.bf16 %v325_v21, %v324_v20  ;;  %v516_v26 = vpack.c.bf16 %v327_v25, %v326_v24  ;;  %v329_v28 = vld [vmem:[%s829_s3 + $0x38] sm:$0xff]  ;;  %v330_v30 = vld [vmem:[%s829_s3 + $0x40] sm:$0xff]  ;;  %v331_v31 = vld [vmem:[%s829_s3 + $0x48] sm:$0xff]  ;;  %vm613_vm0 = vmmov 0   ;;  %v614_v36 = vmov 0.0  }
   0x8   :  { %509 = vmatprep.subr.bf16.mxu0 %v611_v18  ;;  %v519_v29 = vpack.c.bf16 %v329_v28, %v328_v27  ;;  %v522_v32 = vpack.c.bf16 %v331_v31, %v330_v30  ;;  %v332_v33 = vld [vmem:[%s829_s3 + $0x50] sm:$0xff]  ;;  %v333_v34 = vld [vmem:[%s829_s3 + $0x58] sm:$0xff]  ;;  %506 = vmatprep.mubr.msk.f32.mxu0 %vm613_vm0, %v614_v36  ;;  %v334_v37 = vld [vmem:[%s829_s3 + $0x60] sm:$0xff]  ;;  %vm408_vm1 = vcmask 64512  }
   0x9   :  { %511 = vmatpush3.bf16.msra.mxu0 %v510_v19  ;;  %v525_v35 = vpack.c.bf16 %v333_v34, %v332_v33  ;;  %v335_v38 = vld [vmem:[%s829_s3 + $0x68] sm:$0xff]  ;;  %v336_v40 = vld [vmem:[%s829_s3 + $0x70] sm:$0xff]  ;;  %v337_v41 = vld [vmem:[%s829_s3 + $0x78] sm:$0xff] }
   0xa   :  { %512 = vmatprep.subr.bf16.mxu0 %v611_v18  ;;  %v528_v39 = vpack.c.bf16 %v335_v38, %v334_v37  ;;  %v531_v42 = vpack.c.bf16 %v337_v41, %v336_v40  ;;  %v424_v45 = vld [vmem:[%s827_s1] ss:$0 sm:$0xff]  ;;  %v426_v47 = vld [vmem:[%s827_s1 + $0x1] ss:$0 sm:$0xff]  ;;  %v428_v51 = vld [vmem:[%s827_s1 + $0x2] ss:$0 sm:$0xff] }
   0xb   :  { %557 = vset.pattern.permute.xlu1 %v600_v5  ;;  %558 = vset.pattern.permute.xlu0 %v601_v6  ;;  %v425_v46 = vld [vmem:[%s828_s2] ss:$0 sm:$0xff]  ;;  %v427_v48 = vld [vmem:[%s828_s2 + $0x1] ss:$0 sm:$0xff]  ;;  %v429_v52 = vld [vmem:[%s828_s2 + $0x2] ss:$0 sm:$0xff] }
   0xc   :  { %95 = vperm.xlu1 %557, %v649_v0   ;;  %113 = vperm.xlu0 %558, %v649_v0   ;;  %v430_v57 = vld [vmem:[%s827_s1 + $0x3] ss:$0 sm:$0xff]  ;;  %v432_v63 = vld [vmem:[%s827_s1 + $0x4] ss:$0 sm:$0xff]  ;;  %v434_v6 = vld [vmem:[%s827_s1 + $0x5] ss:$0 sm:$0xff] }
   0xd   :  { %514 = vmatpush3.bf16.msra.mxu0 %v513_v23  ;;  %v431_v58 = vld [vmem:[%s828_s2 + $0x3] ss:$0 sm:$0xff]  ;;  %v436_v17 = vld [vmem:[%s827_s1 + $0x6] ss:$0 sm:$0xff]  ;;  %v438_v24 = vld [vmem:[%s827_s1 + $0x7] ss:$0 sm:$0xff] }
   0xe   :  { %515 = vmatprep.subr.bf16.mxu0 %v611_v18  ;;  %v439_v25 = vld [vmem:[%s828_s2 + $0x7] ss:$0 sm:$0xff]  ;;  %v440_v27 = vld [vmem:[%s827_s1 + $0x8] ss:$0 sm:$0xff]  ;;  %v442_v38 = vld [vmem:[%s827_s1 + $0x9] ss:$0 sm:$0xff] }
   0xf   :  { %v441_v28 = vld [vmem:[%s828_s2 + $0x8] ss:$0 sm:$0xff] }
  0x10   :  { %559 = vset.pattern.permute.xlu1 %v602_v7  ;;  %561 = vset.pattern.permute.xlu0 %v603_v8  ;;  %v435_v7 = vld [vmem:[%s828_s2 + $0x5] ss:$0 sm:$0xff] }
  0x11   :  { %131 = vperm.xlu1 %559, %v649_v0   ;;  %167 = vperm.xlu0 %561, %v649_v0  }
  0x12   :  { %517 = vmatpush3.bf16.msra.mxu0 %v516_v26 }
  0x13   :  { %518 = vmatprep.subr.bf16.mxu0 %v611_v18 }
  0x15   :  { %560 = vset.pattern.permute.xlu1 %v604_v9  ;;  %564 = vset.pattern.permute.xlu0 %v605_v10 }
  0x16   :  { %149 = vperm.xlu1 %560, %v649_v0   ;;  %221 = vperm.xlu0 %564, %v649_v0  }
  0x17   :  { %520 = vmatpush3.bf16.msra.mxu0 %v519_v29 }
  0x18   :  { %521 = vmatprep.subr.bf16.mxu0 %v611_v18 }
  0x1a   :  { %562 = vset.pattern.permute.xlu1 %v606_v11  ;;  %567 = vset.pattern.permute.xlu0 %v607_v12 }
  0x1b   :  { %185 = vperm.xlu1 %562, %v649_v0   ;;  %275 = vperm.xlu0 %567, %v649_v0  }
  0x1c   :  { %523 = vmatpush3.bf16.msra.mxu0 %v522_v32 }
  0x1d   :  { %524 = vmatprep.subr.bf16.mxu0 %v611_v18 }
  0x1f   :  { %563 = vset.pattern.permute.xlu1 %v608_v13  ;;  %569 = vset.pattern.permute.xlu0 %v609_v14 }
  0x20   :  { %203 = vperm.xlu1 %563, %v649_v0   ;;  %526 = vmatpush3.bf16.msra.mxu0 %v525_v35 }
  0x21   :  { %527 = vmatprep.subr.bf16.mxu0 %v611_v18 }
  0x24   :  { %565 = vset.pattern.permute.xlu1 %v610_v15  ;;  %529 = vmatpush3.bf16.msra.mxu0 %v528_v39  ;;  %v443_v39 = vld [vmem:[%s828_s2 + $0x9] ss:$0 sm:$0xff] }
  0x25   :  { %239 = vperm.xlu1 %565, %v649_v0   ;;  %530 = vmatprep.subr.bf16.mxu0 %v611_v18  ;;  %v437_v18 = vld [vmem:[%s828_s2 + $0x6] ss:$0 sm:$0xff] }
  0x28   :  { %532 = vmatpush3.bf16.msra.mxu0 %v531_v42 }
  0x29   :  { %566 = vset.pattern.permute.xlu1 %v612_v22 }
  0x2a   :  { %257 = vperm.xlu1 %566, %v649_v0  }
  0x2e   :  { %568 = vset.pattern.permute.xlu1 %v609_v14 }
  0x2f   :  { %293 = vperm.xlu1 %568, %v649_v0   ;;  %v433_v0 = vld [vmem:[%s828_s2 + $0x4] ss:$0 sm:$0xff] }
  0x81   :  { %v60_v43 = vpop.permute.xlu1 %59  ;;  %v26_v44 = vpop.permute.xlu0 %25 }
  0x82   :  { %v32_v49 = vmul.f32 %v424_v45, %v26_v44  ;;  %v38_v50 = vmul.f32 %v425_v46, %v26_v44  ;;  %v66_v59 = vmul.f32 %v428_v51, %v60_v43  ;;  %v73_v60 = vmul.f32 %v429_v52, %v60_v43  ;;  %v444_v45 = vld [vmem:[%s827_s1 + $0xa] ss:$0 sm:$0xff] }
  0x83   :  { %v445_v46 = vld [vmem:[%s828_s2 + $0xa] ss:$0 sm:$0xff] }
  0x86   :  { %v78_v53 = vpop.permute.xlu1 %77  ;;  %v42_v54 = vpop.permute.xlu0 %41 }
  0x87   :  { %v48_v55 = vmul.f32 %v426_v47, %v42_v54  ;;  %v55_v56 = vmul.f32 %v427_v48, %v42_v54  ;;  %v84_v1 = vmul.f32 %v430_v57, %v78_v53  ;;  %v91_v2 = vmul.f32 %v431_v58, %v78_v53  ;;  %v446_v48 = vld [vmem:[%s827_s1 + $0xb] ss:$0 sm:$0xff] }
  0x89   :  { %v49_v61 = vadd.f32 %v48_v55, %v32_v49  ;;  %v56_v62 = vadd.f32 %v55_v56, %v38_v50  ;;  %v447_v49 = vld [vmem:[%s828_s2 + $0xb] ss:$0 sm:$0xff] }
  0x8b   :  { %v67_v3 = vadd.f32 %v66_v59, %v49_v61  ;;  %v74_v4 = vadd.f32 %v73_v60, %v56_v62  ;;  %v96_v5 = vpop.permute.xlu1 %95  ;;  %v114_v8 = vpop.permute.xlu0 %113  ;;  %v448_v59 = vld [vmem:[%s827_s1 + $0xc] ss:$0 sm:$0xff] }
  0x8c   :  { %v102_v9 = vmul.f32 %v432_v63, %v96_v5  ;;  %v109_v10 = vmul.f32 %v433_v0, %v96_v5  ;;  %v120_v13 = vmul.f32 %v434_v6, %v114_v8  ;;  %v127_v14 = vmul.f32 %v435_v7, %v114_v8  ;;  %v449_v60 = vld [vmem:[%s828_s2 + $0xc] ss:$0 sm:$0xff]  ;;  %v450_v5 = vld [vmem:[%s827_s1 + $0xd] ss:$0 sm:$0xff] }
  0x8d   :  { %v85_v11 = vadd.f32 %v84_v1, %v67_v3  ;;  %v92_v12 = vadd.f32 %v91_v2, %v74_v4  ;;  %v452_v2 = vld [vmem:[%s827_s1 + $0xe] ss:$0 sm:$0xff]  ;;  %v451_v6 = vld [vmem:[%s828_s2 + $0xd] ss:$0 sm:$0xff] }
  0x8e   :  { %v453_v3 = vld [vmem:[%s828_s2 + $0xe] ss:$0 sm:$0xff] }
  0x8f   :  { %v103_v15 = vadd.f32 %v102_v9, %v85_v11  ;;  %v110_v16 = vadd.f32 %v109_v10, %v92_v12 }
  0x90   :  { %v132_v19 = vpop.permute.xlu1 %131  ;;  %v168_v29 = vpop.permute.xlu0 %167 }
  0x91   :  { %v121_v20 = vadd.f32 %v120_v13, %v103_v15  ;;  %v128_v21 = vadd.f32 %v127_v14, %v110_v16  ;;  %v138_v22 = vmul.f32 %v436_v17, %v132_v19  ;;  %v145_v23 = vmul.f32 %v437_v18, %v132_v19  ;;  %v454_v16 = vld [vmem:[%s827_s1 + $0xf] ss:$0 sm:$0xff]  ;;  %s615_s1 = smov [#allocation2]  }
  0x92   :  { %v174_v36 = vmul.f32 %v440_v27, %v168_v29  ;;  %v181_v37 = vmul.f32 %v441_v28, %v168_v29  ;;  %v455_v17 = vld [vmem:[%s828_s2 + $0xf] ss:$0 sm:$0xff]  ;;  %v456_v27 = vld [vmem:[%s830_s4] ss:$0 sm:$0xff]  ;;  %s416_s2 = sshll.u32 %s615_s1, 4  ;;  %s417_s2 = int_to_ptr.vmem [resolvable:$true] %s416_s2 }
  0x93   :  { %v139_v30 = vadd.f32 %v138_v22, %v121_v20  ;;  %v146_v31 = vadd.f32 %v145_v23, %v128_v21  ;;  %s572_s11 = scalar_lea.vmem %s417_s2, 128  ;;  %p577_p1 = scmp.lt.s32.totalorder %s417_s2, %s417_s2 }
  0x94   :  { %p573_p0 = scmp.ne.s32.totalorder %s417_s2, %s572_s11  ;;  %p578_p2 = scmp.lt.s32.totalorder %s572_s11, %s572_s11 }
  0x95   :  { %v150_v26 = vpop.permute.xlu1 %149  ;;  %v222_v50 = vpop.permute.xlu0 %221 }
  0x96   :  { %v156_v32 = vmul.f32 %v438_v24, %v150_v26  ;;  %v163_v33 = vmul.f32 %v439_v25, %v150_v26  ;;  %v228_v57 = vmul.f32 %v446_v48, %v222_v50  ;;  %v235_v58 = vmul.f32 %v447_v49, %v222_v50  ;;  %p579_p3 = por %p578_p2, %p577_p1 }
  0x98   :  { %v157_v34 = vadd.f32 %v156_v32, %v139_v30  ;;  %v164_v35 = vadd.f32 %v163_v33, %v146_v31  ;;  %p580_p4 = pnand %p579_p3, %p573_p0 }
  0x9a   :  { %v186_v40 = vpop.permute.xlu1 %185  ;;  %v175_v41 = vadd.f32 %v174_v36, %v157_v34  ;;  %v182_v42 = vadd.f32 %v181_v37, %v164_v35  ;;  %v276_v4 = vpop.permute.xlu0 %275 }
  0x9b   :  { %v192_v43 = vmul.f32 %v442_v38, %v186_v40  ;;  %v199_v44 = vmul.f32 %v443_v39, %v186_v40  ;;  %v282_v8 = vmul.f32 %v452_v2, %v276_v4  ;;  %v289_v9 = vmul.f32 %v453_v3, %v276_v4 }
  0x9d   :  { %v193_v51 = vadd.f32 %v192_v43, %v175_v41  ;;  %v200_v52 = vadd.f32 %v199_v44, %v182_v42 }
  0x9f   :  { %v204_v47 = vpop.permute.xlu1 %203 }
  0xa0   :  { %v210_v53 = vmul.f32 %v444_v45, %v204_v47  ;;  %v217_v54 = vmul.f32 %v445_v46, %v204_v47 }
  0xa2   :  { %v211_v55 = vadd.f32 %v210_v53, %v193_v51  ;;  %v218_v56 = vadd.f32 %v217_v54, %v200_v52 }
  0xa4   :  { %v240_v61 = vpop.permute.xlu1 %239  ;;  %v229_v62 = vadd.f32 %v228_v57, %v211_v55  ;;  %v236_v63 = vadd.f32 %v235_v58, %v218_v56 }
  0xa5   :  { %v246_v0 = vmul.f32 %v448_v59, %v240_v61  ;;  %v253_v1 = vmul.f32 %v449_v60, %v240_v61 }
  0xa7   :  { %v247_v10 = vadd.f32 %v246_v0, %v229_v62  ;;  %v254_v11 = vadd.f32 %v253_v1, %v236_v63 }
  0xa9   :  { %v258_v7 = vpop.permute.xlu1 %257 }
  0xaa   :  { %v264_v12 = vmul.f32 %v450_v5, %v258_v7  ;;  %v271_v13 = vmul.f32 %v451_v6, %v258_v7 }
  0xac   :  { %v265_v14 = vadd.f32 %v264_v12, %v247_v10  ;;  %v272_v15 = vadd.f32 %v271_v13, %v254_v11 }
  0xae   :  { %v283_v18 = vadd.f32 %v282_v8, %v265_v14  ;;  %v290_v19 = vadd.f32 %v289_v9, %v272_v15  ;;  %v294_v20 = vpop.permute.xlu1 %293 }
  0xaf   :  { %v300_v21 = vmul.f32 %v454_v16, %v294_v20  ;;  %v307_v22 = vmul.f32 %v455_v17, %v294_v20 }
  0xb1   :  { %v301_v23 = vadd.f32 %v300_v21, %v283_v18  ;;  %v308_v24 = vadd.f32 %v307_v22, %v290_v19 }
  0xb3   :  { %v309_v25 = vmul.f32 %v301_v23, %v301_v23  ;;  %v310_v26 = vmul.f32 %v308_v24, %v308_v24 }
  0xb5   :  { %v311_v28 = vadd.f32 %v310_v26, %v309_v25 }
  0xb7   :  { %v319_v29 = vadd.f32 %v456_v27, %v311_v28 }
  0xb9   :  { %570 = vlog2.f32 %v319_v29 }
  0xc3   :  { %v571_v30 = vpop.eup %570 }
  0xc4   :  { %v321_v31 = vmul.f32 0.6931472, %v571_v30 }
  0xc6   :  { %507 = vmatmul.mubr.f32.vlgmr.msra.gmra.mrb[0].mxu0 %v321_v31 }
 0x199   :  { %v404_v32 = vpop.f32.mrb[0].mxu0 }
 0x19a   :  { %409 = vst.msk [vmem:[#allocation2] sm:$0xff] %vm408_vm1, %v404_v32  ;;  %v508_v33 = vpop.f32.mrb[1].mxu0 }
 0x19b   :  { %583 = shalt.err (!%p580_p4)
}
 0x19c   :  { %s584_s13 = scalar_lea.hbm %s831_s5, 128 }
 0x19d   :  { %p585_p5 = scmp.ne.s32.totalorder %s831_s5, %s584_s13  ;;  %p588_p6 = scmp.lt.u32.totalorder %s584_s13, %s831_s5 }
 0x19f   :  { %p590_p7 = pnand %p588_p6, %p585_p5 }
 0x1a1   :  { %593 = shalt.err (!%p590_p7)
}
 0x1a2   :  { %419 = dma.vmem_to_hbm [thread:$0]  %s417_s2, 128, %s831_s5, [#allocation3]  }
 0x1a3   :  { %594 = dma.done.wait [#allocation3], 128  }
 0x1a4   :  { %595 = vsyncadd [#allocation3], 4294967168 }
 0x1a5   :  { %423 = vsyncpa [#allocation3], 1 }

// kernel: tpu_custom_call.1
= control target key start
LH: loop header
LB: loop body
LE: loop exit
PB: predicated region body
PF: predicated region fallthrough
CT: control target
= control target key end

     0   :  { %v596_v1 = vmov 2   ;;  %v597_v2 = vmov 0   ;;  %s826_s0 = inlined_call_operand.vmem [shape: f32[8,16], index: 0, kind: input, shape index: {}]   ;;  %s827_s1 = inlined_call_operand.vmem [shape: f32[16,128], index: 1, kind: input, shape index: {}]   ;;  %s828_s2 = inlined_call_operand.vmem [shape: f32[16,128], index: 2, kind: input, shape index: {}]   ;;  %s829_s3 = inlined_call_operand.vmem [shape: f32[128,8], index: 3, kind: input, shape index: {}]   ;;  %s830_s4 = inlined_call_operand.vmem [shape: f32[1,128], index: 4, kind: input, shape index: {}]   ;;  %s831_s5 = inlined_call_operand.hbm [shape: f32[8,8], index: 5, kind: output, shape index: {}]  }
   0x1   :  { %v649_v0 = vld [vmem:[%s826_s0] sm:$0xff]  ;;  %555 = vset.pattern.permute.xlu1 %v596_v1  ;;  %553 = vset.pattern.permute.xlu0 %v597_v2 }
   0x2   :  { %59 = vperm.xlu1 %555, %v649_v0   ;;  %25 = vperm.xlu0 %553, %v649_v0  }
   0x3   :  { %10 = vsyncpa [#allocation3], 0  ;;  %v598_v3 = vmov 3   ;;  %v599_v4 = vmov 1   ;;  %v600_v5 = vmov 4   ;;  %v601_v6 = vmov 5  }
   0x4   :  { %v602_v7 = vmov 6   ;;  %v603_v8 = vmov 8   ;;  %v604_v9 = vmov 7   ;;  %v605_v10 = vmov 11   ;;  %v322_v16 = vld [vmem:[%s829_s3] sm:$0xff]  ;;  %v323_v17 = vld [vmem:[%s829_s3 + $0x8] sm:$0xff] }
   0x5   :  { %v606_v11 = vmov 9   ;;  %v607_v12 = vmov 14   ;;  %v608_v13 = vmov 10   ;;  %v609_v14 = vmov 15   ;;  %v324_v20 = vld [vmem:[%s829_s3 + $0x10] sm:$0xff]  ;;  %v325_v21 = vld [vmem:[%s829_s3 + $0x18] sm:$0xff] }
   0x6   :  { %556 = vset.pattern.permute.xlu1 %v598_v3  ;;  %554 = vset.pattern.permute.xlu0 %v599_v4  ;;  %v610_v15 = vmov 12   ;;  %v611_v18 = vmov 0.0|0.0   ;;  %v510_v19 = vpack.c.bf16 %v323_v17, %v322_v16  ;;  %v612_v22 = vmov 13   ;;  %v326_v24 = vld [vmem:[%s829_s3 + $0x20] sm:$0xff]  ;;  %v327_v25 = vld [vmem:[%s829_s3 + $0x28] sm:$0xff]  ;;  %v328_v27 = vld [vmem:[%s829_s3 + $0x30] sm:$0xff] }
   0x7   :  { %77 = vperm.xlu1 %556, %v649_v0   ;;  %41 = vperm.xlu0 %554, %v649_v0   ;;  %v513_v23 = vpack.c.bf16 %v325_v21, %v324_v20  ;;  %v516_v26 = vpack.c.bf16 %v327_v25, %v326_v24  ;;  %v329_v28 = vld [vmem:[%s829_s3 + $0x38] sm:$0xff]  ;;  %v330_v30 = vld [vmem:[%s829_s3 + $0x40] sm:$0xff]  ;;  %v331_v31 = vld [vmem:[%s829_s3 + $0x48] sm:$0xff]  ;;  %vm613_vm0 = vmmov 0   ;;  %v614_v36 = vmov 0.0  }
   0x8   :  { %509 = vmatprep.subr.bf16.mxu0 %v611_v18  ;;  %v519_v29 = vpack.c.bf16 %v329_v28, %v328_v27  ;;  %v522_v32 = vpack.c.bf16 %v331_v31, %v330_v30  ;;  %v332_v33 = vld [vmem:[%s829_s3 + $0x50] sm:$0xff]  ;;  %v333_v34 = vld [vmem:[%s829_s3 + $0x58] sm:$0xff]  ;;  %506 = vmatprep.mubr.msk.f32.mxu0 %vm613_vm0, %v614_v36  ;;  %v334_v37 = vld [vmem:[%s829_s3 + $0x60] sm:$0xff]  ;;  %vm408_vm1 = vcmask 64512  }
   0x9   :  { %511 = vmatpush3.bf16.msra.mxu0 %v510_v19  ;;  %v525_v35 = vpack.c.bf16 %v333_v34, %v332_v33  ;;  %v335_v38 = vld [vmem:[%s829_s3 + $0x68] sm:$0xff]  ;;  %v336_v40 = vld [vmem:[%s829_s3 + $0x70] sm:$0xff]  ;;  %v337_v41 = vld [vmem:[%s829_s3 + $0x78] sm:$0xff] }
   0xa   :  { %512 = vmatprep.subr.bf16.mxu0 %v611_v18  ;;  %v528_v39 = vpack.c.bf16 %v335_v38, %v334_v37  ;;  %v531_v42 = vpack.c.bf16 %v337_v41, %v336_v40  ;;  %v424_v45 = vld [vmem:[%s827_s1] ss:$0 sm:$0xff]  ;;  %v426_v47 = vld [vmem:[%s827_s1 + $0x1] ss:$0 sm:$0xff]  ;;  %v428_v51 = vld [vmem:[%s827_s1 + $0x2] ss:$0 sm:$0xff] }
   0xb   :  { %557 = vset.pattern.permute.xlu1 %v600_v5  ;;  %558 = vset.pattern.permute.xlu0 %v601_v6  ;;  %v425_v46 = vld [vmem:[%s828_s2] ss:$0 sm:$0xff]  ;;  %v427_v48 = vld [vmem:[%s828_s2 + $0x1] ss:$0 sm:$0xff]  ;;  %v429_v52 = vld [vmem:[%s828_s2 + $0x2] ss:$0 sm:$0xff] }
   0xc   :  { %95 = vperm.xlu1 %557, %v649_v0   ;;  %113 = vperm.xlu0 %558, %v649_v0   ;;  %v430_v57 = vld [vmem:[%s827_s1 + $0x3] ss:$0 sm:$0xff]  ;;  %v432_v63 = vld [vmem:[%s827_s1 + $0x4] ss:$0 sm:$0xff]  ;;  %v434_v6 = vld [vmem:[%s827_s1 + $0x5] ss:$0 sm:$0xff] }
   0xd   :  { %514 = vmatpush3.bf16.msra.mxu0 %v513_v23  ;;  %v431_v58 = vld [vmem:[%s828_s2 + $0x3] ss:$0 sm:$0xff]  ;;  %v436_v17 = vld [vmem:[%s827_s1 + $0x6] ss:$0 sm:$0xff]  ;;  %v438_v24 = vld [vmem:[%s827_s1 + $0x7] ss:$0 sm:$0xff] }
   0xe   :  { %515 = vmatprep.subr.bf16.mxu0 %v611_v18  ;;  %v439_v25 = vld [vmem:[%s828_s2 + $0x7] ss:$0 sm:$0xff]  ;;  %v440_v27 = vld [vmem:[%s827_s1 + $0x8] ss:$0 sm:$0xff]  ;;  %v442_v38 = vld [vmem:[%s827_s1 + $0x9] ss:$0 sm:$0xff] }
   0xf   :  { %v441_v28 = vld [vmem:[%s828_s2 + $0x8] ss:$0 sm:$0xff] }
  0x10   :  { %559 = vset.pattern.permute.xlu1 %v602_v7  ;;  %561 = vset.pattern.permute.xlu0 %v603_v8  ;;  %v435_v7 = vld [vmem:[%s828_s2 + $0x5] ss:$0 sm:$0xff] }
  0x11   :  { %131 = vperm.xlu1 %559, %v649_v0   ;;  %167 = vperm.xlu0 %561, %v649_v0  }
  0x12   :  { %517 = vmatpush3.bf16.msra.mxu0 %v516_v26 }
  0x13   :  { %518 = vmatprep.subr.bf16.mxu0 %v611_v18 }
  0x15   :  { %560 = vset.pattern.permute.xlu1 %v604_v9  ;;  %564 = vset.pattern.permute.xlu0 %v605_v10 }
  0x16   :  { %149 = vperm.xlu1 %560, %v649_v0   ;;  %221 = vperm.xlu0 %564, %v649_v0  }
  0x17   :  { %520 = vmatpush3.bf16.msra.mxu0 %v519_v29 }
  0x18   :  { %521 = vmatprep.subr.bf16.mxu0 %v611_v18 }
  0x1a   :  { %562 = vset.pattern.permute.xlu1 %v606_v11  ;;  %567 = vset.pattern.permute.xlu0 %v607_v12 }
  0x1b   :  { %185 = vperm.xlu1 %562, %v649_v0   ;;  %275 = vperm.xlu0 %567, %v649_v0  }
  0x1c   :  { %523 = vmatpush3.bf16.msra.mxu0 %v522_v32 }
  0x1d   :  { %524 = vmatprep.subr.bf16.mxu0 %v611_v18 }
  0x1f   :  { %563 = vset.pattern.permute.xlu1 %v608_v13  ;;  %569 = vset.pattern.permute.xlu0 %v609_v14 }
  0x20   :  { %203 = vperm.xlu1 %563, %v649_v0   ;;  %526 = vmatpush3.bf16.msra.mxu0 %v525_v35 }
  0x21   :  { %527 = vmatprep.subr.bf16.mxu0 %v611_v18 }
  0x24   :  { %565 = vset.pattern.permute.xlu1 %v610_v15  ;;  %529 = vmatpush3.bf16.msra.mxu0 %v528_v39  ;;  %v443_v39 = vld [vmem:[%s828_s2 + $0x9] ss:$0 sm:$0xff] }
  0x25   :  { %239 = vperm.xlu1 %565, %v649_v0   ;;  %530 = vmatprep.subr.bf16.mxu0 %v611_v18  ;;  %v437_v18 = vld [vmem:[%s828_s2 + $0x6] ss:$0 sm:$0xff] }
  0x28   :  { %532 = vmatpush3.bf16.msra.mxu0 %v531_v42 }
  0x29   :  { %566 = vset.pattern.permute.xlu1 %v612_v22 }
  0x2a   :  { %257 = vperm.xlu1 %566, %v649_v0  }
  0x2e   :  { %568 = vset.pattern.permute.xlu1 %v609_v14 }
  0x2f   :  { %293 = vperm.xlu1 %568, %v649_v0   ;;  %v433_v0 = vld [vmem:[%s828_s2 + $0x4] ss:$0 sm:$0xff] }
  0x81   :  { %v60_v43 = vpop.permute.xlu1 %59  ;;  %v26_v44 = vpop.permute.xlu0 %25 }
  0x82   :  { %v32_v49 = vmul.f32 %v424_v45, %v26_v44  ;;  %v38_v50 = vmul.f32 %v425_v46, %v26_v44  ;;  %v66_v59 = vmul.f32 %v428_v51, %v60_v43  ;;  %v73_v60 = vmul.f32 %v429_v52, %v60_v43  ;;  %v444_v45 = vld [vmem:[%s827_s1 + $0xa] ss:$0 sm:$0xff] }
  0x83   :  { %v445_v46 = vld [vmem:[%s828_s2 + $0xa] ss:$0 sm:$0xff] }
  0x86   :  { %v78_v53 = vpop.permute.xlu1 %77  ;;  %v42_v54 = vpop.permute.xlu0 %41 }
  0x87   :  { %v48_v55 = vmul.f32 %v426_v47, %v42_v54  ;;  %v55_v56 = vmul.f32 %v427_v48, %v42_v54  ;;  %v84_v1 = vmul.f32 %v430_v57, %v78_v53  ;;  %v91_v2 = vmul.f32 %v431_v58, %v78_v53  ;;  %v446_v48 = vld [vmem:[%s827_s1 + $0xb] ss:$0 sm:$0xff] }
  0x89   :  { %v49_v61 = vadd.f32 %v48_v55, %v32_v49  ;;  %v56_v62 = vadd.f32 %v55_v56, %v38_v50  ;;  %v447_v49 = vld [vmem:[%s828_s2 + $0xb] ss:$0 sm:$0xff] }
  0x8b   :  { %v67_v3 = vadd.f32 %v66_v59, %v49_v61  ;;  %v74_v4 = vadd.f32 %v73_v60, %v56_v62  ;;  %v96_v5 = vpop.permute.xlu1 %95  ;;  %v114_v8 = vpop.permute.xlu0 %113  ;;  %v448_v59 = vld [vmem:[%s827_s1 + $0xc] ss:$0 sm:$0xff] }
  0x8c   :  { %v102_v9 = vmul.f32 %v432_v63, %v96_v5  ;;  %v109_v10 = vmul.f32 %v433_v0, %v96_v5  ;;  %v120_v13 = vmul.f32 %v434_v6, %v114_v8  ;;  %v127_v14 = vmul.f32 %v435_v7, %v114_v8  ;;  %v449_v60 = vld [vmem:[%s828_s2 + $0xc] ss:$0 sm:$0xff]  ;;  %v450_v5 = vld [vmem:[%s827_s1 + $0xd] ss:$0 sm:$0xff] }
  0x8d   :  { %v85_v11 = vadd.f32 %v84_v1, %v67_v3  ;;  %v92_v12 = vadd.f32 %v91_v2, %v74_v4  ;;  %v452_v2 = vld [vmem:[%s827_s1 + $0xe] ss:$0 sm:$0xff]  ;;  %v451_v6 = vld [vmem:[%s828_s2 + $0xd] ss:$0 sm:$0xff] }
  0x8e   :  { %v453_v3 = vld [vmem:[%s828_s2 + $0xe] ss:$0 sm:$0xff] }
  0x8f   :  { %v103_v15 = vadd.f32 %v102_v9, %v85_v11  ;;  %v110_v16 = vadd.f32 %v109_v10, %v92_v12 }
  0x90   :  { %v132_v19 = vpop.permute.xlu1 %131  ;;  %v168_v29 = vpop.permute.xlu0 %167 }
  0x91   :  { %v121_v20 = vadd.f32 %v120_v13, %v103_v15  ;;  %v128_v21 = vadd.f32 %v127_v14, %v110_v16  ;;  %v138_v22 = vmul.f32 %v436_v17, %v132_v19  ;;  %v145_v23 = vmul.f32 %v437_v18, %v132_v19  ;;  %v454_v16 = vld [vmem:[%s827_s1 + $0xf] ss:$0 sm:$0xff]  ;;  %s615_s1 = smov [#allocation2]  }
  0x92   :  { %v174_v36 = vmul.f32 %v440_v27, %v168_v29  ;;  %v181_v37 = vmul.f32 %v441_v28, %v168_v29  ;;  %v455_v17 = vld [vmem:[%s828_s2 + $0xf] ss:$0 sm:$0xff]  ;;  %v456_v27 = vld [vmem:[%s830_s4] ss:$0 sm:$0xff]  ;;  %s416_s2 = sshll.u32 %s615_s1, 4  ;;  %s417_s2 = int_to_ptr.vmem [resolvable:$true] %s416_s2 }
  0x93   :  { %v139_v30 = vadd.f32 %v138_v22, %v121_v20  ;;  %v146_v31 = vadd.f32 %v145_v23, %v128_v21  ;;  %s572_s11 = scalar_lea.vmem %s417_s2, 128  ;;  %p577_p1 = scmp.lt.s32.totalorder %s417_s2, %s417_s2 }
  0x94   :  { %p573_p0 = scmp.ne.s32.totalorder %s417_s2, %s572_s11  ;;  %p578_p2 = scmp.lt.s32.totalorder %s572_s11, %s572_s11 }
  0x95   :  { %v150_v26 = vpop.permute.xlu1 %149  ;;  %v222_v50 = vpop.permute.xlu0 %221 }
  0x96   :  { %v156_v32 = vmul.f32 %v438_v24, %v150_v26  ;;  %v163_v33 = vmul.f32 %v439_v25, %v150_v26  ;;  %v228_v57 = vmul.f32 %v446_v48, %v222_v50  ;;  %v235_v58 = vmul.f32 %v447_v49, %v222_v50  ;;  %p579_p3 = por %p578_p2, %p577_p1 }
  0x98   :  { %v157_v34 = vadd.f32 %v156_v32, %v139_v30  ;;  %v164_v35 = vadd.f32 %v163_v33, %v146_v31  ;;  %p580_p4 = pnand %p579_p3, %p573_p0 }
  0x9a   :  { %v186_v40 = vpop.permute.xlu1 %185  ;;  %v175_v41 = vadd.f32 %v174_v36, %v157_v34  ;;  %v182_v42 = vadd.f32 %v181_v37, %v164_v35  ;;  %v276_v4 = vpop.permute.xlu0 %275 }
  0x9b   :  { %v192_v43 = vmul.f32 %v442_v38, %v186_v40  ;;  %v199_v44 = vmul.f32 %v443_v39, %v186_v40  ;;  %v282_v8 = vmul.f32 %v452_v2, %v276_v4  ;;  %v289_v9 = vmul.f32 %v453_v3, %v276_v4 }
  0x9d   :  { %v193_v51 = vadd.f32 %v192_v43, %v175_v41  ;;  %v200_v52 = vadd.f32 %v199_v44, %v182_v42 }
  0x9f   :  { %v204_v47 = vpop.permute.xlu1 %203 }
  0xa0   :  { %v210_v53 = vmul.f32 %v444_v45, %v204_v47  ;;  %v217_v54 = vmul.f32 %v445_v46, %v204_v47 }
  0xa2   :  { %v211_v55 = vadd.f32 %v210_v53, %v193_v51  ;;  %v218_v56 = vadd.f32 %v217_v54, %v200_v52 }
  0xa4   :  { %v240_v61 = vpop.permute.xlu1 %239  ;;  %v229_v62 = vadd.f32 %v228_v57, %v211_v55  ;;  %v236_v63 = vadd.f32 %v235_v58, %v218_v56 }
  0xa5   :  { %v246_v0 = vmul.f32 %v448_v59, %v240_v61  ;;  %v253_v1 = vmul.f32 %v449_v60, %v240_v61 }
  0xa7   :  { %v247_v10 = vadd.f32 %v246_v0, %v229_v62  ;;  %v254_v11 = vadd.f32 %v253_v1, %v236_v63 }
  0xa9   :  { %v258_v7 = vpop.permute.xlu1 %257 }
  0xaa   :  { %v264_v12 = vmul.f32 %v450_v5, %v258_v7  ;;  %v271_v13 = vmul.f32 %v451_v6, %v258_v7 }
  0xac   :  { %v265_v14 = vadd.f32 %v264_v12, %v247_v10  ;;  %v272_v15 = vadd.f32 %v271_v13, %v254_v11 }
  0xae   :  { %v283_v18 = vadd.f32 %v282_v8, %v265_v14  ;;  %v290_v19 = vadd.f32 %v289_v9, %v272_v15  ;;  %v294_v20 = vpop.permute.xlu1 %293 }
  0xaf   :  { %v300_v21 = vmul.f32 %v454_v16, %v294_v20  ;;  %v307_v22 = vmul.f32 %v455_v17, %v294_v20 }
  0xb1   :  { %v301_v23 = vadd.f32 %v300_v21, %v283_v18  ;;  %v308_v24 = vadd.f32 %v307_v22, %v290_v19 }
  0xb3   :  { %v309_v25 = vmul.f32 %v301_v23, %v301_v23  ;;  %v310_v26 = vmul.f32 %v308_v24, %v308_v24 }
  0xb5   :  { %v311_v28 = vadd.f32 %v310_v26, %v309_v25 }
  0xb7   :  { %v319_v29 = vadd.f32 %v456_v27, %v311_v28 }
  0xb9   :  { %570 = vlog2.f32 %v319_v29 }
  0xc3   :  { %v571_v30 = vpop.eup %570 }
  0xc4   :  { %v321_v31 = vmul.f32 0.6931472, %v571_v30 }
  0xc6   :  { %507 = vmatmul.mubr.f32.vlgmr.msra.gmra.mrb[0].mxu0 %v321_v31 }
 0x199   :  { %v404_v32 = vpop.f32.mrb[0].mxu0 }
 0x19a   :  { %409 = vst.msk [vmem:[#allocation2] sm:$0xff] %vm408_vm1, %v404_v32  ;;  %v508_v33 = vpop.f32.mrb[1].mxu0 }
 0x19b   :  { %583 = shalt.err (!%p580_p4)
}
 0x19c   :  { %s584_s13 = scalar_lea.hbm %s831_s5, 128 }
 0x19d   :  { %p585_p5 = scmp.ne.s32.totalorder %s831_s5, %s584_s13  ;;  %p588_p6 = scmp.lt.u32.totalorder %s584_s13, %s831_s5 }
 0x19f   :  { %p590_p7 = pnand %p588_p6, %p585_p5 }
 0x1a1   :  { %593 = shalt.err (!%p590_p7)
}
 0x1a2   :  { %419 = dma.vmem_to_hbm [thread:$0]  %s417_s2, 128, %s831_s5, [#allocation3]  }
 0x1a3   :  { %594 = dma.done.wait [#allocation3], 128  }
 0x1a4   :  { %595 = vsyncadd [#allocation3], 4294967168 }
 0x1a5   :  { %423 = vsyncpa [#allocation3], 1 }

</bundles_post_ra>
